<compile_context>
chip_gen: v5e
topology: v5e:2x2
jax: 0.10.0
libtpu: 0.0.40
codegen_flags: <defaults>
</compile_context>

<pallas_src>
import numpy as np
import jax
import jax.numpy as jnp
from jax import lax
from jax.experimental import pallas as pl
from jax.experimental.pallas import tpu as pltpu

LRELU_SLOPE = 0.1
BN_EPS = 1e-5
PADB = 2  # universal spatial padding border used for every in-kernel buffer


# ----------------------------------------------------------------------------
# BN folding + weight packing helpers (trace-time, runs in XLA on tiny tensors)
# ----------------------------------------------------------------------------
def fold_bn(bn):
    gamma, beta, mean, var = bn
    scale = gamma / jnp.sqrt(var + BN_EPS)
    shift = beta - mean * scale
    return scale, shift


def pack_conv(w_oihw, k, pad, dil, scale, cin_pad, wp, base):
    """Pack a KxK conv into (Cout, K*K*cin_pad) columns (BN scale folded) plus
    the per-tap slice starts into the universally padded flat buffer."""
    ci = w_oihw.shape[1]
    starts, cols = [], []
    for dh in range(k):
        for dw in range(k):
            off = (dh * dil - pad) * wp + (dw * dil - pad)
            starts.append(base + off)
            wt = w_oihw[:, :, dh, dw]                       # (Cout, Cin)
            if cin_pad > ci:
                wt = jnp.pad(wt, ((0, 0), (0, cin_pad - ci)))
            cols.append(wt)
    return starts, jnp.concatenate(cols, axis=1) * scale[:, None]


# ----------------------------------------------------------------------------
# Fused Pallas kernel (whole block, one grid step per batch element)
# ----------------------------------------------------------------------------
def _make_block_kernel(cin_p, cout, cup, cdn, H, W, starts_f, starts_c):
    Hp, Wp = H + 2 * PADB, W + 2 * PADB
    PS = Hp * Wp                      # padded flat spatial size
    L = (H - 1) * Wp + W              # "shifted-flat" conv output length
    BASE = PADB * Wp + PADB           # flat position of output pixel (0, 0)
    Q = (H // 2) * (W // 2)           # down-sampled spatial size
    Tf = len(starts_f)
    Tc = len(starts_c)

    def kernel(x_ref, wf_ref, wc1_ref, wc2_ref, wup_ref, wd_ref, s_ref,
               shf_ref, shc1_ref, shc2_ref, shup_ref, shd_ref,
               o_ref, oup_ref, odn_ref,
               pad_a, pad_b, tap_ref, g_ref):
        # columns j = h*Wp + w ; only w < W are real output pixels
        col = lax.broadcasted_iota(jnp.int32, (cout, L), 1)
        valid = (col % Wp) < W

        def lrelu(v):
            return jnp.where(v >= 0, v, LRELU_SLOPE * v)

        # ---------------- feature_fuse: 1x1 + 3x3 + dilated-3x3 + BN ---------
        for t, s in enumerate(starts_f):
            tap_ref[t * cin_p:(t + 1) * cin_p, :] = x_ref[:, s:s + L]
        y = jnp.dot(wf_ref[...], tap_ref[0:Tf * cin_p, :],
                    preferred_element_type=jnp.float32)
        y = y + shf_ref[...]
        pad_a[...] = jnp.zeros((cout, PS), jnp.float32)
        pad_a[:, BASE:BASE + L] = jnp.where(valid, y, 0.0)

        # ---------------- conv1: Conv3x3 -> BN -> LeakyReLU -------------------
        for t, s in enumerate(starts_c):
            tap_ref[t * cout:(t + 1) * cout, :] = pad_a[:, s:s + L]
        y = jnp.dot(wc1_ref[...], tap_ref[0:Tc * cout, :],
                    preferred_element_type=jnp.float32)
        y = lrelu(y + shc1_ref[...])
        pad_b[...] = jnp.zeros((cout, PS), jnp.float32)
        pad_b[:, BASE:BASE + L] = jnp.where(valid, y, 0.0)

        # ---------------- conv2: Conv3x3 -> BN -> LeakyReLU -------------------
        for t, s in enumerate(starts_c):
            tap_ref[t * cout:(t + 1) * cout, :] = pad_b[:, s:s + L]
        y = jnp.dot(wc2_ref[...], tap_ref[0:Tc * cout, :],
                    preferred_element_type=jnp.float32)
        y = lrelu(y + shc2_ref[...])                      # (cout, L)

        # compact row stride Wp -> W and store the main output (lane-dense)
        for h in range(H):
            o_ref[:, h * W:(h + 1) * W] = y[:, h * Wp:h * Wp + W]
        y2 = o_ref[...]                                   # (cout, H*W)

        # ---------------- up: ConvTranspose2d k2 s2 == 4 pointwise convs ------
        u = jnp.dot(wup_ref[...], y2, preferred_element_type=jnp.float32)
        oup_ref[...] = lrelu(u + shup_ref[...])           # (4*cup, H*W) blocked

        # ---------------- down: Conv2d k2 s2 via selection-matmul gather ------
        g = jnp.dot(y2, s_ref[...], preferred_element_type=jnp.float32)
        for ab in range(4):
            g_ref[ab * cout:(ab + 1) * cout, :] = g[:, ab * Q:(ab + 1) * Q]
        d = jnp.dot(wd_ref[...], g_ref[...], preferred_element_type=jnp.float32)
        odn_ref[...] = lrelu(d + shd_ref[...])            # (cdn, Q)

    return kernel


# ----------------------------------------------------------------------------
# Public wrapper (NCHW in / NCHW out, like the PyTorch module)
# ----------------------------------------------------------------------------
def block_fwd_nchw(x_nchw, params):
    N, in_c, H, W = x_nchw.shape
    out_c = params["fuse"]["w11"].shape[0]
    cup, cdn = out_c // 2, 2 * out_c
    cin_p = ((in_c + 7) // 8) * 8                 # pad input channels to 8
    Hp, Wp = H + 2 * PADB, W + 2 * PADB
    PS = Hp * Wp
    L = (H - 1) * Wp + W
    BASE = PADB * Wp + PADB
    Hh, Wh = H // 2, W // 2
    Q = Hh * Wh

    # Padded NCHW input, flattened spatial (single HBM->VMEM DMA per image).
    xp = jnp.pad(x_nchw.astype(jnp.float32),
                 ((0, 0), (0, cin_p - in_c), (PADB, PADB), (PADB, PADB)))
    xp = xp.reshape(N, cin_p, PS)

    # ---- feature_fuse weights (BN scale folded) ----
    f = params["fuse"]
    sc_f, sh_f = fold_bn(f["bn"])
    s11, W11 = pack_conv(f["w11"], 1, 0, 1, sc_f, cin_p, Wp, BASE)
    s33, W33 = pack_conv(f["w33"], 3, 1, 1, sc_f, cin_p, Wp, BASE)
    s3d, W3d = pack_conv(f["w33d"], 3, 2, 2, sc_f, cin_p, Wp, BASE)
    starts_f = s11 + s33 + s3d
    Wf = jnp.concatenate([W11, W33, W3d], axis=1)           # (out_c, 19*cin_p)

    # ---- conv module weights ----
    c = params["conv"]
    sc1, sh1 = fold_bn(c["bn1"])
    sc2, sh2 = fold_bn(c["bn2"])
    starts_c, Wc1 = pack_conv(c["w1"], 3, 1, 1, sc1, out_c, Wp, BASE)
    _, Wc2 = pack_conv(c["w2"], 3, 1, 1, sc2, out_c, Wp, BASE)

    # ---- up weights: rows grouped by (a*2+b, cup) ----
    u = params["up"]
    sc_u, sh_u = fold_bn(u["bn"])
    wu = jnp.transpose(u["w"], (2, 3, 1, 0))                 # (a, b, cup, out_c)
    Wup = (wu * sc_u[None, None, :, None]).reshape(4 * cup, out_c)
    sh_up_rows = jnp.tile(sh_u, 4)

    # ---- down weights: columns grouped by (a*2+b, out_c) ----
    dn = params["down"]
    sc_d, sh_d = fold_bn(dn["bn"])
    Wd = jnp.transpose(dn["w"], (0, 2, 3, 1)).reshape(cdn, 4 * out_c) * sc_d[:, None]

    # ---- constant stride-2 gather matrix S[p, (a*2+b)*Q + q] ----
    S_np = np.zeros((H * W, 4 * Q), np.float32)
    for a in range(2):
        for b in range(2):
            for hq in range(Hh):
                for wq in range(Wh):
                    p_src = (2 * hq + a) * W + (2 * wq + b)
                    S_np[p_src, (a * 2 + b) * Q + hq * Wh + wq] = 1.0
    S = jnp.asarray(S_np)

    kernel = _make_block_kernel(cin_p, out_c, cup, cdn, H, W,
                                tuple(starts_f), tuple(starts_c))
    n_tap_rows = max(len(starts_f) * cin_p, len(starts_c) * out_c)

    def const2(shape):
        return pl.BlockSpec(shape, lambda n: (0, 0))

    o_main, o_up_blk, o_dn = pl.pallas_call(
        kernel,
        out_shape=(jax.ShapeDtypeStruct((N, out_c, H * W), jnp.float32),
                   jax.ShapeDtypeStruct((N, 4 * cup, H * W), jnp.float32),
                   jax.ShapeDtypeStruct((N, cdn, Q), jnp.float32)),
        grid=(N,),
        in_specs=[
            pl.BlockSpec((None, cin_p, PS), lambda n: (n, 0, 0)),
            const2(Wf.shape), const2(Wc1.shape), const2(Wc2.shape),
            const2(Wup.shape), const2(Wd.shape), const2(S.shape),
            const2((out_c, 1)), const2((out_c, 1)), const2((out_c, 1)),
            const2((4 * cup, 1)), const2((cdn, 1)),
        ],
        out_specs=(pl.BlockSpec((None, out_c, H * W), lambda n: (n, 0, 0)),
                   pl.BlockSpec((None, 4 * cup, H * W), lambda n: (n, 0, 0)),
                   pl.BlockSpec((None, cdn, Q), lambda n: (n, 0, 0))),
        scratch_shapes=[pltpu.VMEM((out_c, PS), jnp.float32),      # padded act A
                        pltpu.VMEM((out_c, PS), jnp.float32),      # padded act B
                        pltpu.VMEM((n_tap_rows, L), jnp.float32),  # packed taps
                        pltpu.VMEM((4 * out_c, Q), jnp.float32)],  # down taps
        compiler_params=pltpu.CompilerParams(
            dimension_semantics=("parallel",)),
    )(xp, Wf, Wc1, Wc2, Wup, Wd, S,
      sh_f.reshape(-1, 1), sh1.reshape(-1, 1), sh2.reshape(-1, 1),
      sh_up_rows.reshape(-1, 1), sh_d.reshape(-1, 1))

    out = o_main.reshape(N, out_c, H, W)
    out_up = (o_up_blk.reshape(N, 2, 2, cup, H, W)
              .transpose(0, 3, 4, 1, 5, 2).reshape(N, cup, 2 * H, 2 * W))
    out_down = o_dn.reshape(N, cdn, Hh, Wh)
    return out, out_up, out_down


# ----------------------------------------------------------------------------
# Pure-JAX reference (lax convs) for correctness checking
# ----------------------------------------------------------------------------
def _ref_conv(x, w_oihw, stride=1, dilation=1, padding=0):
    w_hwio = jnp.transpose(w_oihw, (2, 3, 1, 0))
    return lax.conv_general_dilated(
        x, w_hwio, (stride, stride), [(padding, padding), (padding, padding)],
        rhs_dilation=(dilation, dilation),
        dimension_numbers=("NHWC", "HWIO", "NHWC"),
        precision=lax.Precision.HIGHEST)


def _ref_bn(x, bn):
    gamma, beta, mean, var = bn
    return (x - mean) / jnp.sqrt(var + BN_EPS) * gamma + beta


def _ref_lrelu(x):
    return jnp.where(x >= 0, x, LRELU_SLOPE * x)


def ref_block_fwd_nchw(x_nchw, params):
    x = jnp.transpose(x_nchw, (0, 2, 3, 1))
    f = params["fuse"]
    y = (_ref_conv(x, f["w11"]) + _ref_conv(x, f["w33"], padding=1)
         + _ref_conv(x, f["w33d"], padding=2, dilation=2))
    y = _ref_bn(y, f["bn"])
    c = params["conv"]
    h = _ref_lrelu(_ref_bn(_ref_conv(y, c["w1"], padding=1), c["bn1"]))
    h = _ref_lrelu(_ref_bn(_ref_conv(h, c["w2"], padding=1), c["bn2"]))
    u = params["up"]
    wt = u["w"][:, :, ::-1, ::-1]                            # flip spatial
    w_hwio = jnp.transpose(wt, (2, 3, 0, 1))
    xu = lax.conv_general_dilated(h, w_hwio, (1, 1), [(1, 1), (1, 1)],
                                  lhs_dilation=(2, 2),
                                  dimension_numbers=("NHWC", "HWIO", "NHWC"),
                                  precision=lax.Precision.HIGHEST)
    xu = _ref_lrelu(_ref_bn(xu, u["bn"]))
    d = params["down"]
    xd = _ref_lrelu(_ref_bn(_ref_conv(h, d["w"], stride=2), d["bn"]))
    to_nchw = lambda a: jnp.transpose(a, (0, 3, 1, 2))
    return to_nchw(h), to_nchw(xu), to_nchw(xd)


# ----------------------------------------------------------------------------
# Deterministic parameter init + demo
# ----------------------------------------------------------------------------
def init_params(key, in_c, out_c):
    keys = iter(jax.random.split(key, 32))

    def w(shape):
        return jax.random.normal(next(keys), shape, jnp.float32) * 0.1

    def bn(ch):
        gamma = 1.0 + 0.1 * jax.random.normal(next(keys), (ch,), jnp.float32)
        beta = 0.1 * jax.random.normal(next(keys), (ch,), jnp.float32)
        mean = 0.05 * jax.random.normal(next(keys), (ch,), jnp.float32)
        var = 0.5 + jnp.abs(jax.random.normal(next(keys), (ch,), jnp.float32))
        return (gamma, beta, mean, var)

    return {
        "fuse": {"w11": w((out_c, in_c, 1, 1)),
                 "w33": w((out_c, in_c, 3, 3)),
                 "w33d": w((out_c, in_c, 3, 3)),
                 "bn": bn(out_c)},
        "conv": {"w1": w((out_c, out_c, 3, 3)), "bn1": bn(out_c),
                 "w2": w((out_c, out_c, 3, 3)), "bn2": bn(out_c)},
        "up": {"w": w((out_c, out_c // 2, 2, 2)), "bn": bn(out_c // 2)},
        "down": {"w": w((2 * out_c, out_c, 2, 2)), "bn": bn(2 * out_c)},
    }


if __name__ == "__main__":
    N, in_c, out_c, H, W = 2, 4, 8, 16, 16
    key = jax.random.PRNGKey(0)
    kx, kp = jax.random.split(key)
    x = jax.random.normal(kx, (N, in_c, H, W), jnp.float32)   # NCHW like PyTorch
    params = init_params(kp, in_c, out_c)

    fwd = jax.jit(block_fwd_nchw)
    out, out_up, out_down = fwd(x, params)
    jax.block_until_ready((out, out_up, out_down))

    ref, ref_up, ref_down = ref_block_fwd_nchw(x, params)
    assert out.shape == (N, out_c, H, W)
    assert out_up.shape == (N, out_c // 2, 2 * H, 2 * W)
    assert out_down.shape == (N, 2 * out_c, H // 2, W // 2)
    np.testing.assert_allclose(np.asarray(out), np.asarray(ref), rtol=2e-4, atol=2e-4)
    np.testing.assert_allclose(np.asarray(out_up), np.asarray(ref_up), rtol=2e-4, atol=2e-4)
    np.testing.assert_allclose(np.asarray(out_down), np.asarray(ref_down), rtol=2e-4, atol=2e-4)

    print("KERNEL_OK")
</pallas_src>

<mosaic_0001>
module attributes {stable_mosaic.version = 11 : i64} {
  func.func @kernel(%arg0: i32, %arg1: memref<1x8x400xf32, #tpu.memory_space<vmem>>, %arg2: memref<8x152xf32, #tpu.memory_space<vmem>>, %arg3: memref<8x72xf32, #tpu.memory_space<vmem>>, %arg4: memref<8x72xf32, #tpu.memory_space<vmem>>, %arg5: memref<16x8xf32, #tpu.memory_space<vmem>>, %arg6: memref<16x32xf32, #tpu.memory_space<vmem>>, %arg7: memref<256x256xf32, #tpu.memory_space<vmem>>, %arg8: memref<8x1xf32, #tpu.memory_space<vmem>>, %arg9: memref<8x1xf32, #tpu.memory_space<vmem>>, %arg10: memref<8x1xf32, #tpu.memory_space<vmem>>, %arg11: memref<16x1xf32, #tpu.memory_space<vmem>>, %arg12: memref<16x1xf32, #tpu.memory_space<vmem>>, %arg13: memref<1x8x256xf32, #tpu.memory_space<vmem>>, %arg14: memref<1x16x256xf32, #tpu.memory_space<vmem>>, %arg15: memref<1x16x64xf32, #tpu.memory_space<vmem>>, %arg16: memref<8x400xf32, #tpu.memory_space<vmem>>, %arg17: memref<8x400xf32, #tpu.memory_space<vmem>>, %arg18: memref<152x316xf32, #tpu.memory_space<vmem>>, %arg19: memref<32x64xf32, #tpu.memory_space<vmem>>) attributes {dimension_semantics = [#tpu.dimension_semantics<parallel>], iteration_bounds = array<i64: 2>, scalar_prefetch = 0 : i64, scratch_operands = 4 : i64, tpu.core_type = #tpu.core_type<tc>, window_params = [{transform_indices = @transform_0, window_bounds = array<i64: 1, 8, 400>}, {pipeline_mode = #tpu.pipeline_mode<synchronous>, transform_indices = @transform_1, window_bounds = array<i64: 8, 152>}, {pipeline_mode = #tpu.pipeline_mode<synchronous>, transform_indices = @transform_2, window_bounds = array<i64: 8, 72>}, {pipeline_mode = #tpu.pipeline_mode<synchronous>, transform_indices = @transform_3, window_bounds = array<i64: 8, 72>}, {pipeline_mode = #tpu.pipeline_mode<synchronous>, transform_indices = @transform_4, window_bounds = array<i64: 16, 8>}, {pipeline_mode = #tpu.pipeline_mode<synchronous>, transform_indices = @transform_5, window_bounds = array<i64: 16, 32>}, {pipeline_mode = #tpu.pipeline_mode<synchronous>, transform_indices = @transform_6, window_bounds = array<i64: 256, 256>}, {pipeline_mode = #tpu.pipeline_mode<synchronous>, transform_indices = @transform_7, window_bounds = array<i64: 8, 1>}, {pipeline_mode = #tpu.pipeline_mode<synchronous>, transform_indices = @transform_8, window_bounds = array<i64: 8, 1>}, {pipeline_mode = #tpu.pipeline_mode<synchronous>, transform_indices = @transform_9, window_bounds = array<i64: 8, 1>}, {pipeline_mode = #tpu.pipeline_mode<synchronous>, transform_indices = @transform_10, window_bounds = array<i64: 16, 1>}, {pipeline_mode = #tpu.pipeline_mode<synchronous>, transform_indices = @transform_11, window_bounds = array<i64: 16, 1>}, {transform_indices = @transform_12, window_bounds = array<i64: 1, 8, 256>}, {transform_indices = @transform_13, window_bounds = array<i64: 1, 16, 256>}, {transform_indices = @transform_14, window_bounds = array<i64: 1, 16, 64>}]} {
    %0 = tpu.iota {dimensions = array<i32: 1>} : vector<8x316xi32>
    %c20_i32 = arith.constant 20 : i32
    %c0_i32 = arith.constant 0 : i32
    %1 = arith.cmpi eq, %c20_i32, %c0_i32 : i32
    %c1_i32 = arith.constant 1 : i32
    %2 = arith.select %1, %c1_i32, %c20_i32 : i32
    %3 = vector.broadcast %2 : i32 to vector<8x316xi32>
    %4 = arith.remsi %0, %3 : vector<8x316xi32>
    %c0_i32_0 = arith.constant 0 : i32
    %5 = vector.broadcast %c0_i32_0 : i32 to vector<8x316xi32>
    %6 = arith.cmpi ne, %4, %5 : vector<8x316xi32>
    %c0_i32_1 = arith.constant 0 : i32
    %7 = vector.broadcast %c0_i32_1 : i32 to vector<8x316xi32>
    %8 = arith.cmpi slt, %4, %7 : vector<8x316xi32>
    %c0_i32_2 = arith.constant 0 : i32
    %9 = arith.cmpi slt, %2, %c0_i32_2 : i32
    %10 = vector.broadcast %9 : i1 to vector<8x316xi1>
    %11 = vector.broadcast %10 : vector<8x316xi1> to vector<8x316xi1>
    %12 = arith.xori %8, %11 : vector<8x316xi1>
    %13 = arith.andi %12, %6 : vector<8x316xi1>
    %14 = vector.broadcast %2 : i32 to vector<8x316xi32>
    %15 = arith.addi %4, %14 : vector<8x316xi32>
    %16 = arith.select %13, %15, %4 : vector<8x316xi1>, vector<8x316xi32>
    %c16_i32 = arith.constant 16 : i32
    %17 = vector.broadcast %c16_i32 : i32 to vector<8x316xi32>
    %18 = arith.cmpi slt, %16, %17 : vector<8x316xi32>
    %c0 = arith.constant 0 : index
    %c0_3 = arith.constant 0 : index
    %c42 = arith.constant 42 : index
    %19 = vector.load %arg1[%c0, %c0_3, %c42] : memref<1x8x400xf32, #tpu.memory_space<vmem>>, vector<1x8x316xf32>
    %20 = vector.shape_cast %19 : vector<1x8x316xf32> to vector<8x316xf32>
    %c0_4 = arith.constant 0 : index
    %c0_5 = arith.constant 0 : index
    %21 = vector.load %arg18[%c0_4, %c0_5] : memref<152x316xf32, #tpu.memory_space<vmem>>, vector<8x316xf32>
    tpu.vector_store %arg18[%c0_4, %c0_5], %20 {strides = array<i32>} : memref<152x316xf32, #tpu.memory_space<vmem>>, vector<8x316xf32>,
    %c0_6 = arith.constant 0 : index
    %c0_7 = arith.constant 0 : index
    %c21 = arith.constant 21 : index
    %22 = vector.load %arg1[%c0_6, %c0_7, %c21] : memref<1x8x400xf32, #tpu.memory_space<vmem>>, vector<1x8x316xf32>
    %23 = vector.shape_cast %22 : vector<1x8x316xf32> to vector<8x316xf32>
    %c8 = arith.constant 8 : index
    %c0_8 = arith.constant 0 : index
    %24 = vector.load %arg18[%c8, %c0_8] : memref<152x316xf32, #tpu.memory_space<vmem>>, vector<8x316xf32>
    tpu.vector_store %arg18[%c8, %c0_8], %23 {strides = array<i32>} : memref<152x316xf32, #tpu.memory_space<vmem>>, vector<8x316xf32>,
    %c0_9 = arith.constant 0 : index
    %c0_10 = arith.constant 0 : index
    %c22 = arith.constant 22 : index
    %25 = vector.load %arg1[%c0_9, %c0_10, %c22] : memref<1x8x400xf32, #tpu.memory_space<vmem>>, vector<1x8x316xf32>
    %26 = vector.shape_cast %25 : vector<1x8x316xf32> to vector<8x316xf32>
    %c16 = arith.constant 16 : index
    %c0_11 = arith.constant 0 : index
    %27 = vector.load %arg18[%c16, %c0_11] : memref<152x316xf32, #tpu.memory_space<vmem>>, vector<8x316xf32>
    tpu.vector_store %arg18[%c16, %c0_11], %26 {strides = array<i32>} : memref<152x316xf32, #tpu.memory_space<vmem>>, vector<8x316xf32>,
    %c0_12 = arith.constant 0 : index
    %c0_13 = arith.constant 0 : index
    %c23 = arith.constant 23 : index
    %28 = vector.load %arg1[%c0_12, %c0_13, %c23] : memref<1x8x400xf32, #tpu.memory_space<vmem>>, vector<1x8x316xf32>
    %29 = vector.shape_cast %28 : vector<1x8x316xf32> to vector<8x316xf32>
    %c24 = arith.constant 24 : index
    %c0_14 = arith.constant 0 : index
    %30 = vector.load %arg18[%c24, %c0_14] : memref<152x316xf32, #tpu.memory_space<vmem>>, vector<8x316xf32>
    tpu.vector_store %arg18[%c24, %c0_14], %29 {strides = array<i32>} : memref<152x316xf32, #tpu.memory_space<vmem>>, vector<8x316xf32>,
    %c0_15 = arith.constant 0 : index
    %c0_16 = arith.constant 0 : index
    %c41 = arith.constant 41 : index
    %31 = vector.load %arg1[%c0_15, %c0_16, %c41] : memref<1x8x400xf32, #tpu.memory_space<vmem>>, vector<1x8x316xf32>
    %32 = vector.shape_cast %31 : vector<1x8x316xf32> to vector<8x316xf32>
    %c32 = arith.constant 32 : index
    %c0_17 = arith.constant 0 : index
    %33 = vector.load %arg18[%c32, %c0_17] : memref<152x316xf32, #tpu.memory_space<vmem>>, vector<8x316xf32>
    tpu.vector_store %arg18[%c32, %c0_17], %32 {strides = array<i32>} : memref<152x316xf32, #tpu.memory_space<vmem>>, vector<8x316xf32>,
    %c0_18 = arith.constant 0 : index
    %c0_19 = arith.constant 0 : index
    %c42_20 = arith.constant 42 : index
    %34 = vector.load %arg1[%c0_18, %c0_19, %c42_20] : memref<1x8x400xf32, #tpu.memory_space<vmem>>, vector<1x8x316xf32>
    %35 = vector.shape_cast %34 : vector<1x8x316xf32> to vector<8x316xf32>
    %c40 = arith.constant 40 : index
    %c0_21 = arith.constant 0 : index
    %36 = vector.load %arg18[%c40, %c0_21] : memref<152x316xf32, #tpu.memory_space<vmem>>, vector<8x316xf32>
    tpu.vector_store %arg18[%c40, %c0_21], %35 {strides = array<i32>} : memref<152x316xf32, #tpu.memory_space<vmem>>, vector<8x316xf32>,
    %c0_22 = arith.constant 0 : index
    %c0_23 = arith.constant 0 : index
    %c43 = arith.constant 43 : index
    %37 = vector.load %arg1[%c0_22, %c0_23, %c43] : memref<1x8x400xf32, #tpu.memory_space<vmem>>, vector<1x8x316xf32>
    %38 = vector.shape_cast %37 : vector<1x8x316xf32> to vector<8x316xf32>
    %c48 = arith.constant 48 : index
    %c0_24 = arith.constant 0 : index
    %39 = vector.load %arg18[%c48, %c0_24] : memref<152x316xf32, #tpu.memory_space<vmem>>, vector<8x316xf32>
    tpu.vector_store %arg18[%c48, %c0_24], %38 {strides = array<i32>} : memref<152x316xf32, #tpu.memory_space<vmem>>, vector<8x316xf32>,
    %c0_25 = arith.constant 0 : index
    %c0_26 = arith.constant 0 : index
    %c61 = arith.constant 61 : index
    %40 = vector.load %arg1[%c0_25, %c0_26, %c61] : memref<1x8x400xf32, #tpu.memory_space<vmem>>, vector<1x8x316xf32>
    %41 = vector.shape_cast %40 : vector<1x8x316xf32> to vector<8x316xf32>
    %c56 = arith.constant 56 : index
    %c0_27 = arith.constant 0 : index
    %42 = vector.load %arg18[%c56, %c0_27] : memref<152x316xf32, #tpu.memory_space<vmem>>, vector<8x316xf32>
    tpu.vector_store %arg18[%c56, %c0_27], %41 {strides = array<i32>} : memref<152x316xf32, #tpu.memory_space<vmem>>, vector<8x316xf32>,
    %c0_28 = arith.constant 0 : index
    %c0_29 = arith.constant 0 : index
    %c62 = arith.constant 62 : index
    %43 = vector.load %arg1[%c0_28, %c0_29, %c62] : memref<1x8x400xf32, #tpu.memory_space<vmem>>, vector<1x8x316xf32>
    %44 = vector.shape_cast %43 : vector<1x8x316xf32> to vector<8x316xf32>
    %c64 = arith.constant 64 : index
    %c0_30 = arith.constant 0 : index
    %45 = vector.load %arg18[%c64, %c0_30] : memref<152x316xf32, #tpu.memory_space<vmem>>, vector<8x316xf32>
    tpu.vector_store %arg18[%c64, %c0_30], %44 {strides = array<i32>} : memref<152x316xf32, #tpu.memory_space<vmem>>, vector<8x316xf32>,
    %c0_31 = arith.constant 0 : index
    %c0_32 = arith.constant 0 : index
    %c63 = arith.constant 63 : index
    %46 = vector.load %arg1[%c0_31, %c0_32, %c63] : memref<1x8x400xf32, #tpu.memory_space<vmem>>, vector<1x8x316xf32>
    %47 = vector.shape_cast %46 : vector<1x8x316xf32> to vector<8x316xf32>
    %c72 = arith.constant 72 : index
    %c0_33 = arith.constant 0 : index
    %48 = vector.load %arg18[%c72, %c0_33] : memref<152x316xf32, #tpu.memory_space<vmem>>, vector<8x316xf32>
    tpu.vector_store %arg18[%c72, %c0_33], %47 {strides = array<i32>} : memref<152x316xf32, #tpu.memory_space<vmem>>, vector<8x316xf32>,
    %c0_34 = arith.constant 0 : index
    %c0_35 = arith.constant 0 : index
    %c0_36 = arith.constant 0 : index
    %49 = vector.load %arg1[%c0_34, %c0_35, %c0_36] : memref<1x8x400xf32, #tpu.memory_space<vmem>>, vector<1x8x316xf32>
    %50 = vector.shape_cast %49 : vector<1x8x316xf32> to vector<8x316xf32>
    %c80 = arith.constant 80 : index
    %c0_37 = arith.constant 0 : index
    %51 = vector.load %arg18[%c80, %c0_37] : memref<152x316xf32, #tpu.memory_space<vmem>>, vector<8x316xf32>
    tpu.vector_store %arg18[%c80, %c0_37], %50 {strides = array<i32>} : memref<152x316xf32, #tpu.memory_space<vmem>>, vector<8x316xf32>,
    %c0_38 = arith.constant 0 : index
    %c0_39 = arith.constant 0 : index
    %c2 = arith.constant 2 : index
    %52 = vector.load %arg1[%c0_38, %c0_39, %c2] : memref<1x8x400xf32, #tpu.memory_space<vmem>>, vector<1x8x316xf32>
    %53 = vector.shape_cast %52 : vector<1x8x316xf32> to vector<8x316xf32>
    %c88 = arith.constant 88 : index
    %c0_40 = arith.constant 0 : index
    %54 = vector.load %arg18[%c88, %c0_40] : memref<152x316xf32, #tpu.memory_space<vmem>>, vector<8x316xf32>
    tpu.vector_store %arg18[%c88, %c0_40], %53 {strides = array<i32>} : memref<152x316xf32, #tpu.memory_space<vmem>>, vector<8x316xf32>,
    %c0_41 = arith.constant 0 : index
    %c0_42 = arith.constant 0 : index
    %c4 = arith.constant 4 : index
    %55 = vector.load %arg1[%c0_41, %c0_42, %c4] : memref<1x8x400xf32, #tpu.memory_space<vmem>>, vector<1x8x316xf32>
    %56 = vector.shape_cast %55 : vector<1x8x316xf32> to vector<8x316xf32>
    %c96 = arith.constant 96 : index
    %c0_43 = arith.constant 0 : index
    %57 = vector.load %arg18[%c96, %c0_43] : memref<152x316xf32, #tpu.memory_space<vmem>>, vector<8x316xf32>
    tpu.vector_store %arg18[%c96, %c0_43], %56 {strides = array<i32>} : memref<152x316xf32, #tpu.memory_space<vmem>>, vector<8x316xf32>,
    %c0_44 = arith.constant 0 : index
    %c0_45 = arith.constant 0 : index
    %c40_46 = arith.constant 40 : index
    %58 = vector.load %arg1[%c0_44, %c0_45, %c40_46] : memref<1x8x400xf32, #tpu.memory_space<vmem>>, vector<1x8x316xf32>
    %59 = vector.shape_cast %58 : vector<1x8x316xf32> to vector<8x316xf32>
    %c104 = arith.constant 104 : index
    %c0_47 = arith.constant 0 : index
    %60 = vector.load %arg18[%c104, %c0_47] : memref<152x316xf32, #tpu.memory_space<vmem>>, vector<8x316xf32>
    tpu.vector_store %arg18[%c104, %c0_47], %59 {strides = array<i32>} : memref<152x316xf32, #tpu.memory_space<vmem>>, vector<8x316xf32>,
    %c0_48 = arith.constant 0 : index
    %c0_49 = arith.constant 0 : index
    %c42_50 = arith.constant 42 : index
    %61 = vector.load %arg1[%c0_48, %c0_49, %c42_50] : memref<1x8x400xf32, #tpu.memory_space<vmem>>, vector<1x8x316xf32>
    %62 = vector.shape_cast %61 : vector<1x8x316xf32> to vector<8x316xf32>
    %c112 = arith.constant 112 : index
    %c0_51 = arith.constant 0 : index
    %63 = vector.load %arg18[%c112, %c0_51] : memref<152x316xf32, #tpu.memory_space<vmem>>, vector<8x316xf32>
    tpu.vector_store %arg18[%c112, %c0_51], %62 {strides = array<i32>} : memref<152x316xf32, #tpu.memory_space<vmem>>, vector<8x316xf32>,
    %c0_52 = arith.constant 0 : index
    %c0_53 = arith.constant 0 : index
    %c44 = arith.constant 44 : index
    %64 = vector.load %arg1[%c0_52, %c0_53, %c44] : memref<1x8x400xf32, #tpu.memory_space<vmem>>, vector<1x8x316xf32>
    %65 = vector.shape_cast %64 : vector<1x8x316xf32> to vector<8x316xf32>
    %c120 = arith.constant 120 : index
    %c0_54 = arith.constant 0 : index
    %66 = vector.load %arg18[%c120, %c0_54] : memref<152x316xf32, #tpu.memory_space<vmem>>, vector<8x316xf32>
    tpu.vector_store %arg18[%c120, %c0_54], %65 {strides = array<i32>} : memref<152x316xf32, #tpu.memory_space<vmem>>, vector<8x316xf32>,
    %c0_55 = arith.constant 0 : index
    %c0_56 = arith.constant 0 : index
    %c80_57 = arith.constant 80 : index
    %67 = vector.load %arg1[%c0_55, %c0_56, %c80_57] : memref<1x8x400xf32, #tpu.memory_space<vmem>>, vector<1x8x316xf32>
    %68 = vector.shape_cast %67 : vector<1x8x316xf32> to vector<8x316xf32>
    %c128 = arith.constant 128 : index
    %c0_58 = arith.constant 0 : index
    %69 = vector.load %arg18[%c128, %c0_58] : memref<152x316xf32, #tpu.memory_space<vmem>>, vector<8x316xf32>
    tpu.vector_store %arg18[%c128, %c0_58], %68 {strides = array<i32>} : memref<152x316xf32, #tpu.memory_space<vmem>>, vector<8x316xf32>,
    %c0_59 = arith.constant 0 : index
    %c0_60 = arith.constant 0 : index
    %c82 = arith.constant 82 : index
    %70 = vector.load %arg1[%c0_59, %c0_60, %c82] : memref<1x8x400xf32, #tpu.memory_space<vmem>>, vector<1x8x316xf32>
    %71 = vector.shape_cast %70 : vector<1x8x316xf32> to vector<8x316xf32>
    %c136 = arith.constant 136 : index
    %c0_61 = arith.constant 0 : index
    %72 = vector.load %arg18[%c136, %c0_61] : memref<152x316xf32, #tpu.memory_space<vmem>>, vector<8x316xf32>
    tpu.vector_store %arg18[%c136, %c0_61], %71 {strides = array<i32>} : memref<152x316xf32, #tpu.memory_space<vmem>>, vector<8x316xf32>,
    %c0_62 = arith.constant 0 : index
    %c0_63 = arith.constant 0 : index
    %c84 = arith.constant 84 : index
    %73 = vector.load %arg1[%c0_62, %c0_63, %c84] : memref<1x8x400xf32, #tpu.memory_space<vmem>>, vector<1x8x316xf32>
    %74 = vector.shape_cast %73 : vector<1x8x316xf32> to vector<8x316xf32>
    %c144 = arith.constant 144 : index
    %c0_64 = arith.constant 0 : index
    %75 = vector.load %arg18[%c144, %c0_64] : memref<152x316xf32, #tpu.memory_space<vmem>>, vector<8x316xf32>
    tpu.vector_store %arg18[%c144, %c0_64], %74 {strides = array<i32>} : memref<152x316xf32, #tpu.memory_space<vmem>>, vector<8x316xf32>,
    %c0_65 = arith.constant 0 : index
    %c0_66 = arith.constant 0 : index
    %76 = vector.load %arg2[%c0_65, %c0_66] : memref<8x152xf32, #tpu.memory_space<vmem>>, vector<8x152xf32>
    %c0_67 = arith.constant 0 : index
    %c0_68 = arith.constant 0 : index
    %77 = vector.load %arg18[%c0_67, %c0_68] : memref<152x316xf32, #tpu.memory_space<vmem>>, vector<152x316xf32>
    %cst = arith.constant dense<0.000000e+00> : vector<8x316xf32>
    %78 = tpu.matmul %76, %77, %cst {dimension_numbers = #tpu.dot_dimension_numbers<[1], [0], [0], [1], [0, 0, 1, 1], [], []>} : vector<8x152xf32>, vector<152x316xf32>, vector<8x316xf32> -> vector<8x316xf32>
    %c0_69 = arith.constant 0 : index
    %c0_70 = arith.constant 0 : index
    %79 = vector.load %arg8[%c0_69, %c0_70] : memref<8x1xf32, #tpu.memory_space<vmem>>, vector<8x1xf32>
    %80 = vector.broadcast %79 : vector<8x1xf32> to vector<8x316xf32>
    %81 = arith.addf %78, %80 : vector<8x316xf32>
    %cst_71 = arith.constant 0.000000e+00 : f32
    %82 = vector.broadcast %cst_71 : f32 to vector<8x400xf32>
    %c0_72 = arith.constant 0 : index
    %c0_73 = arith.constant 0 : index
    %83 = vector.load %arg16[%c0_72, %c0_73] : memref<8x400xf32, #tpu.memory_space<vmem>>, vector<8x400xf32>
    tpu.vector_store %arg16[%c0_72, %c0_73], %82 {strides = array<i32>} : memref<8x400xf32, #tpu.memory_space<vmem>>, vector<8x400xf32>,
    %cst_74 = arith.constant 0.000000e+00 : f32
    %84 = vector.broadcast %cst_74 : f32 to vector<8x316xf32>
    %85 = arith.select %18, %81, %84 : vector<8x316xi1>, vector<8x316xf32>
    %c0_75 = arith.constant 0 : index
    %c42_76 = arith.constant 42 : index
    %86 = vector.load %arg16[%c0_75, %c42_76] : memref<8x400xf32, #tpu.memory_space<vmem>>, vector<8x316xf32>
    tpu.vector_store %arg16[%c0_75, %c42_76], %85 {strides = array<i32>} : memref<8x400xf32, #tpu.memory_space<vmem>>, vector<8x316xf32>,
    %c0_77 = arith.constant 0 : index
    %c21_78 = arith.constant 21 : index
    %87 = vector.load %arg16[%c0_77, %c21_78] : memref<8x400xf32, #tpu.memory_space<vmem>>, vector<8x316xf32>
    %c0_79 = arith.constant 0 : index
    %c0_80 = arith.constant 0 : index
    %88 = vector.load %arg18[%c0_79, %c0_80] : memref<152x316xf32, #tpu.memory_space<vmem>>, vector<8x316xf32>
    tpu.vector_store %arg18[%c0_79, %c0_80], %87 {strides = array<i32>} : memref<152x316xf32, #tpu.memory_space<vmem>>, vector<8x316xf32>,
    %c0_81 = arith.constant 0 : index
    %c22_82 = arith.constant 22 : index
    %89 = vector.load %arg16[%c0_81, %c22_82] : memref<8x400xf32, #tpu.memory_space<vmem>>, vector<8x316xf32>
    %c8_83 = arith.constant 8 : index
    %c0_84 = arith.constant 0 : index
    %90 = vector.load %arg18[%c8_83, %c0_84] : memref<152x316xf32, #tpu.memory_space<vmem>>, vector<8x316xf32>
    tpu.vector_store %arg18[%c8_83, %c0_84], %89 {strides = array<i32>} : memref<152x316xf32, #tpu.memory_space<vmem>>, vector<8x316xf32>,
    %c0_85 = arith.constant 0 : index
    %c23_86 = arith.constant 23 : index
    %91 = vector.load %arg16[%c0_85, %c23_86] : memref<8x400xf32, #tpu.memory_space<vmem>>, vector<8x316xf32>
    %c16_87 = arith.constant 16 : index
    %c0_88 = arith.constant 0 : index
    %92 = vector.load %arg18[%c16_87, %c0_88] : memref<152x316xf32, #tpu.memory_space<vmem>>, vector<8x316xf32>
    tpu.vector_store %arg18[%c16_87, %c0_88], %91 {strides = array<i32>} : memref<152x316xf32, #tpu.memory_space<vmem>>, vector<8x316xf32>,
    %c0_89 = arith.constant 0 : index
    %c41_90 = arith.constant 41 : index
    %93 = vector.load %arg16[%c0_89, %c41_90] : memref<8x400xf32, #tpu.memory_space<vmem>>, vector<8x316xf32>
    %c24_91 = arith.constant 24 : index
    %c0_92 = arith.constant 0 : index
    %94 = vector.load %arg18[%c24_91, %c0_92] : memref<152x316xf32, #tpu.memory_space<vmem>>, vector<8x316xf32>
    tpu.vector_store %arg18[%c24_91, %c0_92], %93 {strides = array<i32>} : memref<152x316xf32, #tpu.memory_space<vmem>>, vector<8x316xf32>,
    %c0_93 = arith.constant 0 : index
    %c42_94 = arith.constant 42 : index
    %95 = vector.load %arg16[%c0_93, %c42_94] : memref<8x400xf32, #tpu.memory_space<vmem>>, vector<8x316xf32>
    %c32_95 = arith.constant 32 : index
    %c0_96 = arith.constant 0 : index
    %96 = vector.load %arg18[%c32_95, %c0_96] : memref<152x316xf32, #tpu.memory_space<vmem>>, vector<8x316xf32>
    tpu.vector_store %arg18[%c32_95, %c0_96], %95 {strides = array<i32>} : memref<152x316xf32, #tpu.memory_space<vmem>>, vector<8x316xf32>,
    %c0_97 = arith.constant 0 : index
    %c43_98 = arith.constant 43 : index
    %97 = vector.load %arg16[%c0_97, %c43_98] : memref<8x400xf32, #tpu.memory_space<vmem>>, vector<8x316xf32>
    %c40_99 = arith.constant 40 : index
    %c0_100 = arith.constant 0 : index
    %98 = vector.load %arg18[%c40_99, %c0_100] : memref<152x316xf32, #tpu.memory_space<vmem>>, vector<8x316xf32>
    tpu.vector_store %arg18[%c40_99, %c0_100], %97 {strides = array<i32>} : memref<152x316xf32, #tpu.memory_space<vmem>>, vector<8x316xf32>,
    %c0_101 = arith.constant 0 : index
    %c61_102 = arith.constant 61 : index
    %99 = vector.load %arg16[%c0_101, %c61_102] : memref<8x400xf32, #tpu.memory_space<vmem>>, vector<8x316xf32>
    %c48_103 = arith.constant 48 : index
    %c0_104 = arith.constant 0 : index
    %100 = vector.load %arg18[%c48_103, %c0_104] : memref<152x316xf32, #tpu.memory_space<vmem>>, vector<8x316xf32>
    tpu.vector_store %arg18[%c48_103, %c0_104], %99 {strides = array<i32>} : memref<152x316xf32, #tpu.memory_space<vmem>>, vector<8x316xf32>,
    %c0_105 = arith.constant 0 : index
    %c62_106 = arith.constant 62 : index
    %101 = vector.load %arg16[%c0_105, %c62_106] : memref<8x400xf32, #tpu.memory_space<vmem>>, vector<8x316xf32>
    %c56_107 = arith.constant 56 : index
    %c0_108 = arith.constant 0 : index
    %102 = vector.load %arg18[%c56_107, %c0_108] : memref<152x316xf32, #tpu.memory_space<vmem>>, vector<8x316xf32>
    tpu.vector_store %arg18[%c56_107, %c0_108], %101 {strides = array<i32>} : memref<152x316xf32, #tpu.memory_space<vmem>>, vector<8x316xf32>,
    %c0_109 = arith.constant 0 : index
    %c63_110 = arith.constant 63 : index
    %103 = vector.load %arg16[%c0_109, %c63_110] : memref<8x400xf32, #tpu.memory_space<vmem>>, vector<8x316xf32>
    %c64_111 = arith.constant 64 : index
    %c0_112 = arith.constant 0 : index
    %104 = vector.load %arg18[%c64_111, %c0_112] : memref<152x316xf32, #tpu.memory_space<vmem>>, vector<8x316xf32>
    tpu.vector_store %arg18[%c64_111, %c0_112], %103 {strides = array<i32>} : memref<152x316xf32, #tpu.memory_space<vmem>>, vector<8x316xf32>,
    %c0_113 = arith.constant 0 : index
    %c0_114 = arith.constant 0 : index
    %105 = vector.load %arg3[%c0_113, %c0_114] : memref<8x72xf32, #tpu.memory_space<vmem>>, vector<8x72xf32>
    %c0_115 = arith.constant 0 : index
    %c0_116 = arith.constant 0 : index
    %106 = vector.load %arg18[%c0_115, %c0_116] : memref<152x316xf32, #tpu.memory_space<vmem>>, vector<72x316xf32>
    %cst_117 = arith.constant dense<0.000000e+00> : vector<8x316xf32>
    %107 = tpu.matmul %105, %106, %cst_117 {dimension_numbers = #tpu.dot_dimension_numbers<[1], [0], [0], [1], [0, 0, 1, 1], [], []>} : vector<8x72xf32>, vector<72x316xf32>, vector<8x316xf32> -> vector<8x316xf32>
    %c0_118 = arith.constant 0 : index
    %c0_119 = arith.constant 0 : index
    %108 = vector.load %arg9[%c0_118, %c0_119] : memref<8x1xf32, #tpu.memory_space<vmem>>, vector<8x1xf32>
    %109 = vector.broadcast %108 : vector<8x1xf32> to vector<8x316xf32>
    %110 = arith.addf %107, %109 : vector<8x316xf32>
    %cst_120 = arith.constant 0.000000e+00 : f32
    %111 = vector.broadcast %cst_120 : f32 to vector<8x316xf32>
    %112 = arith.cmpf oge, %110, %111 : vector<8x316xf32>
    %cst_121 = arith.constant 1.000000e-01 : f32
    %113 = vector.broadcast %cst_121 : f32 to vector<8x316xf32>
    %114 = arith.mulf %113, %110 : vector<8x316xf32>
    %115 = arith.select %112, %110, %114 : vector<8x316xi1>, vector<8x316xf32>
    %cst_122 = arith.constant 0.000000e+00 : f32
    %116 = vector.broadcast %cst_122 : f32 to vector<8x400xf32>
    %c0_123 = arith.constant 0 : index
    %c0_124 = arith.constant 0 : index
    %117 = vector.load %arg17[%c0_123, %c0_124] : memref<8x400xf32, #tpu.memory_space<vmem>>, vector<8x400xf32>
    tpu.vector_store %arg17[%c0_123, %c0_124], %116 {strides = array<i32>} : memref<8x400xf32, #tpu.memory_space<vmem>>, vector<8x400xf32>,
    %cst_125 = arith.constant 0.000000e+00 : f32
    %118 = vector.broadcast %cst_125 : f32 to vector<8x316xf32>
    %119 = arith.select %18, %115, %118 : vector<8x316xi1>, vector<8x316xf32>
    %c0_126 = arith.constant 0 : index
    %c42_127 = arith.constant 42 : index
    %120 = vector.load %arg17[%c0_126, %c42_127] : memref<8x400xf32, #tpu.memory_space<vmem>>, vector<8x316xf32>
    tpu.vector_store %arg17[%c0_126, %c42_127], %119 {strides = array<i32>} : memref<8x400xf32, #tpu.memory_space<vmem>>, vector<8x316xf32>,
    %c0_128 = arith.constant 0 : index
    %c21_129 = arith.constant 21 : index
    %121 = vector.load %arg17[%c0_128, %c21_129] : memref<8x400xf32, #tpu.memory_space<vmem>>, vector<8x316xf32>
    %c0_130 = arith.constant 0 : index
    %c0_131 = arith.constant 0 : index
    %122 = vector.load %arg18[%c0_130, %c0_131] : memref<152x316xf32, #tpu.memory_space<vmem>>, vector<8x316xf32>
    tpu.vector_store %arg18[%c0_130, %c0_131], %121 {strides = array<i32>} : memref<152x316xf32, #tpu.memory_space<vmem>>, vector<8x316xf32>,
    %c0_132 = arith.constant 0 : index
    %c22_133 = arith.constant 22 : index
    %123 = vector.load %arg17[%c0_132, %c22_133] : memref<8x400xf32, #tpu.memory_space<vmem>>, vector<8x316xf32>
    %c8_134 = arith.constant 8 : index
    %c0_135 = arith.constant 0 : index
    %124 = vector.load %arg18[%c8_134, %c0_135] : memref<152x316xf32, #tpu.memory_space<vmem>>, vector<8x316xf32>
    tpu.vector_store %arg18[%c8_134, %c0_135], %123 {strides = array<i32>} : memref<152x316xf32, #tpu.memory_space<vmem>>, vector<8x316xf32>,
    %c0_136 = arith.constant 0 : index
    %c23_137 = arith.constant 23 : index
    %125 = vector.load %arg17[%c0_136, %c23_137] : memref<8x400xf32, #tpu.memory_space<vmem>>, vector<8x316xf32>
    %c16_138 = arith.constant 16 : index
    %c0_139 = arith.constant 0 : index
    %126 = vector.load %arg18[%c16_138, %c0_139] : memref<152x316xf32, #tpu.memory_space<vmem>>, vector<8x316xf32>
    tpu.vector_store %arg18[%c16_138, %c0_139], %125 {strides = array<i32>} : memref<152x316xf32, #tpu.memory_space<vmem>>, vector<8x316xf32>,
    %c0_140 = arith.constant 0 : index
    %c41_141 = arith.constant 41 : index
    %127 = vector.load %arg17[%c0_140, %c41_141] : memref<8x400xf32, #tpu.memory_space<vmem>>, vector<8x316xf32>
    %c24_142 = arith.constant 24 : index
    %c0_143 = arith.constant 0 : index
    %128 = vector.load %arg18[%c24_142, %c0_143] : memref<152x316xf32, #tpu.memory_space<vmem>>, vector<8x316xf32>
    tpu.vector_store %arg18[%c24_142, %c0_143], %127 {strides = array<i32>} : memref<152x316xf32, #tpu.memory_space<vmem>>, vector<8x316xf32>,
    %c0_144 = arith.constant 0 : index
    %c42_145 = arith.constant 42 : index
    %129 = vector.load %arg17[%c0_144, %c42_145] : memref<8x400xf32, #tpu.memory_space<vmem>>, vector<8x316xf32>
    %c32_146 = arith.constant 32 : index
    %c0_147 = arith.constant 0 : index
    %130 = vector.load %arg18[%c32_146, %c0_147] : memref<152x316xf32, #tpu.memory_space<vmem>>, vector<8x316xf32>
    tpu.vector_store %arg18[%c32_146, %c0_147], %129 {strides = array<i32>} : memref<152x316xf32, #tpu.memory_space<vmem>>, vector<8x316xf32>,
    %c0_148 = arith.constant 0 : index
    %c43_149 = arith.constant 43 : index
    %131 = vector.load %arg17[%c0_148, %c43_149] : memref<8x400xf32, #tpu.memory_space<vmem>>, vector<8x316xf32>
    %c40_150 = arith.constant 40 : index
    %c0_151 = arith.constant 0 : index
    %132 = vector.load %arg18[%c40_150, %c0_151] : memref<152x316xf32, #tpu.memory_space<vmem>>, vector<8x316xf32>
    tpu.vector_store %arg18[%c40_150, %c0_151], %131 {strides = array<i32>} : memref<152x316xf32, #tpu.memory_space<vmem>>, vector<8x316xf32>,
    %c0_152 = arith.constant 0 : index
    %c61_153 = arith.constant 61 : index
    %133 = vector.load %arg17[%c0_152, %c61_153] : memref<8x400xf32, #tpu.memory_space<vmem>>, vector<8x316xf32>
    %c48_154 = arith.constant 48 : index
    %c0_155 = arith.constant 0 : index
    %134 = vector.load %arg18[%c48_154, %c0_155] : memref<152x316xf32, #tpu.memory_space<vmem>>, vector<8x316xf32>
    tpu.vector_store %arg18[%c48_154, %c0_155], %133 {strides = array<i32>} : memref<152x316xf32, #tpu.memory_space<vmem>>, vector<8x316xf32>,
    %c0_156 = arith.constant 0 : index
    %c62_157 = arith.constant 62 : index
    %135 = vector.load %arg17[%c0_156, %c62_157] : memref<8x400xf32, #tpu.memory_space<vmem>>, vector<8x316xf32>
    %c56_158 = arith.constant 56 : index
    %c0_159 = arith.constant 0 : index
    %136 = vector.load %arg18[%c56_158, %c0_159] : memref<152x316xf32, #tpu.memory_space<vmem>>, vector<8x316xf32>
    tpu.vector_store %arg18[%c56_158, %c0_159], %135 {strides = array<i32>} : memref<152x316xf32, #tpu.memory_space<vmem>>, vector<8x316xf32>,
    %c0_160 = arith.constant 0 : index
    %c63_161 = arith.constant 63 : index
    %137 = vector.load %arg17[%c0_160, %c63_161] : memref<8x400xf32, #tpu.memory_space<vmem>>, vector<8x316xf32>
    %c64_162 = arith.constant 64 : index
    %c0_163 = arith.constant 0 : index
    %138 = vector.load %arg18[%c64_162, %c0_163] : memref<152x316xf32, #tpu.memory_space<vmem>>, vector<8x316xf32>
    tpu.vector_store %arg18[%c64_162, %c0_163], %137 {strides = array<i32>} : memref<152x316xf32, #tpu.memory_space<vmem>>, vector<8x316xf32>,
    %c0_164 = arith.constant 0 : index
    %c0_165 = arith.constant 0 : index
    %139 = vector.load %arg4[%c0_164, %c0_165] : memref<8x72xf32, #tpu.memory_space<vmem>>, vector<8x72xf32>
    %c0_166 = arith.constant 0 : index
    %c0_167 = arith.constant 0 : index
    %140 = vector.load %arg18[%c0_166, %c0_167] : memref<152x316xf32, #tpu.memory_space<vmem>>, vector<72x316xf32>
    %cst_168 = arith.constant dense<0.000000e+00> : vector<8x316xf32>
    %141 = tpu.matmul %139, %140, %cst_168 {dimension_numbers = #tpu.dot_dimension_numbers<[1], [0], [0], [1], [0, 0, 1, 1], [], []>} : vector<8x72xf32>, vector<72x316xf32>, vector<8x316xf32> -> vector<8x316xf32>
    %c0_169 = arith.constant 0 : index
    %c0_170 = arith.constant 0 : index
    %142 = vector.load %arg10[%c0_169, %c0_170] : memref<8x1xf32, #tpu.memory_space<vmem>>, vector<8x1xf32>
    %143 = vector.broadcast %142 : vector<8x1xf32> to vector<8x316xf32>
    %144 = arith.addf %141, %143 : vector<8x316xf32>
    %cst_171 = arith.constant 0.000000e+00 : f32
    %145 = vector.broadcast %cst_171 : f32 to vector<8x316xf32>
    %146 = arith.cmpf oge, %144, %145 : vector<8x316xf32>
    %cst_172 = arith.constant 1.000000e-01 : f32
    %147 = vector.broadcast %cst_172 : f32 to vector<8x316xf32>
    %148 = arith.mulf %147, %144 : vector<8x316xf32>
    %149 = arith.select %146, %144, %148 : vector<8x316xi1>, vector<8x316xf32>
    %150 = vector.extract_strided_slice %149 {offsets = [0, 0], sizes = [8, 16], strides = [1, 1]} : vector<8x316xf32> to vector<8x16xf32>
    %c0_173 = arith.constant 0 : index
    %c0_174 = arith.constant 0 : index
    %c0_175 = arith.constant 0 : index
    %151 = vector.load %arg13[%c0_173, %c0_174, %c0_175] : memref<1x8x256xf32, #tpu.memory_space<vmem>>, vector<1x8x16xf32>
    %152 = vector.shape_cast %151 : vector<1x8x16xf32> to vector<8x16xf32>
    %153 = vector.shape_cast %150 : vector<8x16xf32> to vector<1x8x16xf32>
    tpu.vector_store %arg13[%c0_173, %c0_174, %c0_175], %153 {strides = array<i32>} : memref<1x8x256xf32, #tpu.memory_space<vmem>>, vector<1x8x16xf32>,
    %154 = vector.extract_strided_slice %149 {offsets = [0, 20], sizes = [8, 16], strides = [1, 1]} : vector<8x316xf32> to vector<8x16xf32>
    %c0_176 = arith.constant 0 : index
    %c0_177 = arith.constant 0 : index
    %c16_178 = arith.constant 16 : index
    %155 = vector.load %arg13[%c0_176, %c0_177, %c16_178] : memref<1x8x256xf32, #tpu.memory_space<vmem>>, vector<1x8x16xf32>
    %156 = vector.shape_cast %155 : vector<1x8x16xf32> to vector<8x16xf32>
    %157 = vector.shape_cast %154 : vector<8x16xf32> to vector<1x8x16xf32>
    tpu.vector_store %arg13[%c0_176, %c0_177, %c16_178], %157 {strides = array<i32>} : memref<1x8x256xf32, #tpu.memory_space<vmem>>, vector<1x8x16xf32>,
    %158 = vector.extract_strided_slice %149 {offsets = [0, 40], sizes = [8, 16], strides = [1, 1]} : vector<8x316xf32> to vector<8x16xf32>
    %c0_179 = arith.constant 0 : index
    %c0_180 = arith.constant 0 : index
    %c32_181 = arith.constant 32 : index
    %159 = vector.load %arg13[%c0_179, %c0_180, %c32_181] : memref<1x8x256xf32, #tpu.memory_space<vmem>>, vector<1x8x16xf32>
    %160 = vector.shape_cast %159 : vector<1x8x16xf32> to vector<8x16xf32>
    %161 = vector.shape_cast %158 : vector<8x16xf32> to vector<1x8x16xf32>
    tpu.vector_store %arg13[%c0_179, %c0_180, %c32_181], %161 {strides = array<i32>} : memref<1x8x256xf32, #tpu.memory_space<vmem>>, vector<1x8x16xf32>,
    %162 = vector.extract_strided_slice %149 {offsets = [0, 60], sizes = [8, 16], strides = [1, 1]} : vector<8x316xf32> to vector<8x16xf32>
    %c0_182 = arith.constant 0 : index
    %c0_183 = arith.constant 0 : index
    %c48_184 = arith.constant 48 : index
    %163 = vector.load %arg13[%c0_182, %c0_183, %c48_184] : memref<1x8x256xf32, #tpu.memory_space<vmem>>, vector<1x8x16xf32>
    %164 = vector.shape_cast %163 : vector<1x8x16xf32> to vector<8x16xf32>
    %165 = vector.shape_cast %162 : vector<8x16xf32> to vector<1x8x16xf32>
    tpu.vector_store %arg13[%c0_182, %c0_183, %c48_184], %165 {strides = array<i32>} : memref<1x8x256xf32, #tpu.memory_space<vmem>>, vector<1x8x16xf32>,
    %166 = vector.extract_strided_slice %149 {offsets = [0, 80], sizes = [8, 16], strides = [1, 1]} : vector<8x316xf32> to vector<8x16xf32>
    %c0_185 = arith.constant 0 : index
    %c0_186 = arith.constant 0 : index
    %c64_187 = arith.constant 64 : index
    %167 = vector.load %arg13[%c0_185, %c0_186, %c64_187] : memref<1x8x256xf32, #tpu.memory_space<vmem>>, vector<1x8x16xf32>
    %168 = vector.shape_cast %167 : vector<1x8x16xf32> to vector<8x16xf32>
    %169 = vector.shape_cast %166 : vector<8x16xf32> to vector<1x8x16xf32>
    tpu.vector_store %arg13[%c0_185, %c0_186, %c64_187], %169 {strides = array<i32>} : memref<1x8x256xf32, #tpu.memory_space<vmem>>, vector<1x8x16xf32>,
    %170 = vector.extract_strided_slice %149 {offsets = [0, 100], sizes = [8, 16], strides = [1, 1]} : vector<8x316xf32> to vector<8x16xf32>
    %c0_188 = arith.constant 0 : index
    %c0_189 = arith.constant 0 : index
    %c80_190 = arith.constant 80 : index
    %171 = vector.load %arg13[%c0_188, %c0_189, %c80_190] : memref<1x8x256xf32, #tpu.memory_space<vmem>>, vector<1x8x16xf32>
    %172 = vector.shape_cast %171 : vector<1x8x16xf32> to vector<8x16xf32>
    %173 = vector.shape_cast %170 : vector<8x16xf32> to vector<1x8x16xf32>
    tpu.vector_store %arg13[%c0_188, %c0_189, %c80_190], %173 {strides = array<i32>} : memref<1x8x256xf32, #tpu.memory_space<vmem>>, vector<1x8x16xf32>,
    %174 = vector.extract_strided_slice %149 {offsets = [0, 120], sizes = [8, 16], strides = [1, 1]} : vector<8x316xf32> to vector<8x16xf32>
    %c0_191 = arith.constant 0 : index
    %c0_192 = arith.constant 0 : index
    %c96_193 = arith.constant 96 : index
    %175 = vector.load %arg13[%c0_191, %c0_192, %c96_193] : memref<1x8x256xf32, #tpu.memory_space<vmem>>, vector<1x8x16xf32>
    %176 = vector.shape_cast %175 : vector<1x8x16xf32> to vector<8x16xf32>
    %177 = vector.shape_cast %174 : vector<8x16xf32> to vector<1x8x16xf32>
    tpu.vector_store %arg13[%c0_191, %c0_192, %c96_193], %177 {strides = array<i32>} : memref<1x8x256xf32, #tpu.memory_space<vmem>>, vector<1x8x16xf32>,
    %178 = vector.extract_strided_slice %149 {offsets = [0, 140], sizes = [8, 16], strides = [1, 1]} : vector<8x316xf32> to vector<8x16xf32>
    %c0_194 = arith.constant 0 : index
    %c0_195 = arith.constant 0 : index
    %c112_196 = arith.constant 112 : index
    %179 = vector.load %arg13[%c0_194, %c0_195, %c112_196] : memref<1x8x256xf32, #tpu.memory_space<vmem>>, vector<1x8x16xf32>
    %180 = vector.shape_cast %179 : vector<1x8x16xf32> to vector<8x16xf32>
    %181 = vector.shape_cast %178 : vector<8x16xf32> to vector<1x8x16xf32>
    tpu.vector_store %arg13[%c0_194, %c0_195, %c112_196], %181 {strides = array<i32>} : memref<1x8x256xf32, #tpu.memory_space<vmem>>, vector<1x8x16xf32>,
    %182 = vector.extract_strided_slice %149 {offsets = [0, 160], sizes = [8, 16], strides = [1, 1]} : vector<8x316xf32> to vector<8x16xf32>
    %c0_197 = arith.constant 0 : index
    %c0_198 = arith.constant 0 : index
    %c128_199 = arith.constant 128 : index
    %183 = vector.load %arg13[%c0_197, %c0_198, %c128_199] : memref<1x8x256xf32, #tpu.memory_space<vmem>>, vector<1x8x16xf32>
    %184 = vector.shape_cast %183 : vector<1x8x16xf32> to vector<8x16xf32>
    %185 = vector.shape_cast %182 : vector<8x16xf32> to vector<1x8x16xf32>
    tpu.vector_store %arg13[%c0_197, %c0_198, %c128_199], %185 {strides = array<i32>} : memref<1x8x256xf32, #tpu.memory_space<vmem>>, vector<1x8x16xf32>,
    %186 = vector.extract_strided_slice %149 {offsets = [0, 180], sizes = [8, 16], strides = [1, 1]} : vector<8x316xf32> to vector<8x16xf32>
    %c0_200 = arith.constant 0 : index
    %c0_201 = arith.constant 0 : index
    %c144_202 = arith.constant 144 : index
    %187 = vector.load %arg13[%c0_200, %c0_201, %c144_202] : memref<1x8x256xf32, #tpu.memory_space<vmem>>, vector<1x8x16xf32>
    %188 = vector.shape_cast %187 : vector<1x8x16xf32> to vector<8x16xf32>
    %189 = vector.shape_cast %186 : vector<8x16xf32> to vector<1x8x16xf32>
    tpu.vector_store %arg13[%c0_200, %c0_201, %c144_202], %189 {strides = array<i32>} : memref<1x8x256xf32, #tpu.memory_space<vmem>>, vector<1x8x16xf32>,
    %190 = vector.extract_strided_slice %149 {offsets = [0, 200], sizes = [8, 16], strides = [1, 1]} : vector<8x316xf32> to vector<8x16xf32>
    %c0_203 = arith.constant 0 : index
    %c0_204 = arith.constant 0 : index
    %c160 = arith.constant 160 : index
    %191 = vector.load %arg13[%c0_203, %c0_204, %c160] : memref<1x8x256xf32, #tpu.memory_space<vmem>>, vector<1x8x16xf32>
    %192 = vector.shape_cast %191 : vector<1x8x16xf32> to vector<8x16xf32>
    %193 = vector.shape_cast %190 : vector<8x16xf32> to vector<1x8x16xf32>
    tpu.vector_store %arg13[%c0_203, %c0_204, %c160], %193 {strides = array<i32>} : memref<1x8x256xf32, #tpu.memory_space<vmem>>, vector<1x8x16xf32>,
    %194 = vector.extract_strided_slice %149 {offsets = [0, 220], sizes = [8, 16], strides = [1, 1]} : vector<8x316xf32> to vector<8x16xf32>
    %c0_205 = arith.constant 0 : index
    %c0_206 = arith.constant 0 : index
    %c176 = arith.constant 176 : index
    %195 = vector.load %arg13[%c0_205, %c0_206, %c176] : memref<1x8x256xf32, #tpu.memory_space<vmem>>, vector<1x8x16xf32>
    %196 = vector.shape_cast %195 : vector<1x8x16xf32> to vector<8x16xf32>
    %197 = vector.shape_cast %194 : vector<8x16xf32> to vector<1x8x16xf32>
    tpu.vector_store %arg13[%c0_205, %c0_206, %c176], %197 {strides = array<i32>} : memref<1x8x256xf32, #tpu.memory_space<vmem>>, vector<1x8x16xf32>,
    %198 = vector.extract_strided_slice %149 {offsets = [0, 240], sizes = [8, 16], strides = [1, 1]} : vector<8x316xf32> to vector<8x16xf32>
    %c0_207 = arith.constant 0 : index
    %c0_208 = arith.constant 0 : index
    %c192 = arith.constant 192 : index
    %199 = vector.load %arg13[%c0_207, %c0_208, %c192] : memref<1x8x256xf32, #tpu.memory_space<vmem>>, vector<1x8x16xf32>
    %200 = vector.shape_cast %199 : vector<1x8x16xf32> to vector<8x16xf32>
    %201 = vector.shape_cast %198 : vector<8x16xf32> to vector<1x8x16xf32>
    tpu.vector_store %arg13[%c0_207, %c0_208, %c192], %201 {strides = array<i32>} : memref<1x8x256xf32, #tpu.memory_space<vmem>>, vector<1x8x16xf32>,
    %202 = vector.extract_strided_slice %149 {offsets = [0, 260], sizes = [8, 16], strides = [1, 1]} : vector<8x316xf32> to vector<8x16xf32>
    %c0_209 = arith.constant 0 : index
    %c0_210 = arith.constant 0 : index
    %c208 = arith.constant 208 : index
    %203 = vector.load %arg13[%c0_209, %c0_210, %c208] : memref<1x8x256xf32, #tpu.memory_space<vmem>>, vector<1x8x16xf32>
    %204 = vector.shape_cast %203 : vector<1x8x16xf32> to vector<8x16xf32>
    %205 = vector.shape_cast %202 : vector<8x16xf32> to vector<1x8x16xf32>
    tpu.vector_store %arg13[%c0_209, %c0_210, %c208], %205 {strides = array<i32>} : memref<1x8x256xf32, #tpu.memory_space<vmem>>, vector<1x8x16xf32>,
    %206 = vector.extract_strided_slice %149 {offsets = [0, 280], sizes = [8, 16], strides = [1, 1]} : vector<8x316xf32> to vector<8x16xf32>
    %c0_211 = arith.constant 0 : index
    %c0_212 = arith.constant 0 : index
    %c224 = arith.constant 224 : index
    %207 = vector.load %arg13[%c0_211, %c0_212, %c224] : memref<1x8x256xf32, #tpu.memory_space<vmem>>, vector<1x8x16xf32>
    %208 = vector.shape_cast %207 : vector<1x8x16xf32> to vector<8x16xf32>
    %209 = vector.shape_cast %206 : vector<8x16xf32> to vector<1x8x16xf32>
    tpu.vector_store %arg13[%c0_211, %c0_212, %c224], %209 {strides = array<i32>} : memref<1x8x256xf32, #tpu.memory_space<vmem>>, vector<1x8x16xf32>,
    %210 = vector.extract_strided_slice %149 {offsets = [0, 300], sizes = [8, 16], strides = [1, 1]} : vector<8x316xf32> to vector<8x16xf32>
    %c0_213 = arith.constant 0 : index
    %c0_214 = arith.constant 0 : index
    %c240 = arith.constant 240 : index
    %211 = vector.load %arg13[%c0_213, %c0_214, %c240] : memref<1x8x256xf32, #tpu.memory_space<vmem>>, vector<1x8x16xf32>
    %212 = vector.shape_cast %211 : vector<1x8x16xf32> to vector<8x16xf32>
    %213 = vector.shape_cast %210 : vector<8x16xf32> to vector<1x8x16xf32>
    tpu.vector_store %arg13[%c0_213, %c0_214, %c240], %213 {strides = array<i32>} : memref<1x8x256xf32, #tpu.memory_space<vmem>>, vector<1x8x16xf32>,
    %c0_215 = arith.constant 0 : index
    %c0_216 = arith.constant 0 : index
    %c0_217 = arith.constant 0 : index
    %214 = vector.load %arg13[%c0_215, %c0_216, %c0_217] : memref<1x8x256xf32, #tpu.memory_space<vmem>>, vector<1x8x256xf32>
    %215 = vector.shape_cast %214 : vector<1x8x256xf32> to vector<8x256xf32>
    %c0_218 = arith.constant 0 : index
    %c0_219 = arith.constant 0 : index
    %216 = vector.load %arg5[%c0_218, %c0_219] : memref<16x8xf32, #tpu.memory_space<vmem>>, vector<16x8xf32>
    %cst_220 = arith.constant dense<0.000000e+00> : vector<16x256xf32>
    %217 = tpu.matmul %216, %215, %cst_220 {dimension_numbers = #tpu.dot_dimension_numbers<[1], [0], [0], [1], [0, 0, 1, 1], [], []>} : vector<16x8xf32>, vector<8x256xf32>, vector<16x256xf32> -> vector<16x256xf32>
    %c0_221 = arith.constant 0 : index
    %c0_222 = arith.constant 0 : index
    %218 = vector.load %arg11[%c0_221, %c0_222] : memref<16x1xf32, #tpu.memory_space<vmem>>, vector<16x1xf32>
    %219 = vector.broadcast %218 : vector<16x1xf32> to vector<16x256xf32>
    %220 = arith.addf %217, %219 : vector<16x256xf32>
    %cst_223 = arith.constant 0.000000e+00 : f32
    %221 = vector.broadcast %cst_223 : f32 to vector<16x256xf32>
    %222 = arith.cmpf oge, %220, %221 : vector<16x256xf32>
    %cst_224 = arith.constant 1.000000e-01 : f32
    %223 = vector.broadcast %cst_224 : f32 to vector<16x256xf32>
    %224 = arith.mulf %223, %220 : vector<16x256xf32>
    %225 = arith.select %222, %220, %224 : vector<16x256xi1>, vector<16x256xf32>
    %c0_225 = arith.constant 0 : index
    %c0_226 = arith.constant 0 : index
    %c0_227 = arith.constant 0 : index
    %226 = vector.load %arg14[%c0_225, %c0_226, %c0_227] : memref<1x16x256xf32, #tpu.memory_space<vmem>>, vector<1x16x256xf32>
    %227 = vector.shape_cast %226 : vector<1x16x256xf32> to vector<16x256xf32>
    %228 = vector.shape_cast %225 : vector<16x256xf32> to vector<1x16x256xf32>
    tpu.vector_store %arg14[%c0_225, %c0_226, %c0_227], %228 {strides = array<i32>} : memref<1x16x256xf32, #tpu.memory_space<vmem>>, vector<1x16x256xf32>,
    %c0_228 = arith.constant 0 : index
    %c0_229 = arith.constant 0 : index
    %229 = vector.load %arg7[%c0_228, %c0_229] : memref<256x256xf32, #tpu.memory_space<vmem>>, vector<256x256xf32>
    %cst_230 = arith.constant dense<0.000000e+00> : vector<8x256xf32>
    %230 = tpu.matmul %215, %229, %cst_230 {dimension_numbers = #tpu.dot_dimension_numbers<[1], [0], [0], [1], [0, 0, 1, 1], [], []>} : vector<8x256xf32>, vector<256x256xf32>, vector<8x256xf32> -> vector<8x256xf32>
    %231 = vector.extract_strided_slice %230 {offsets = [0, 0], sizes = [8, 64], strides = [1, 1]} : vector<8x256xf32> to vector<8x64xf32>
    %c0_231 = arith.constant 0 : index
    %c0_232 = arith.constant 0 : index
    %232 = vector.load %arg19[%c0_231, %c0_232] : memref<32x64xf32, #tpu.memory_space<vmem>>, vector<8x64xf32>
    tpu.vector_store %arg19[%c0_231, %c0_232], %231 {strides = array<i32>} : memref<32x64xf32, #tpu.memory_space<vmem>>, vector<8x64xf32>,
    %233 = vector.extract_strided_slice %230 {offsets = [0, 64], sizes = [8, 64], strides = [1, 1]} : vector<8x256xf32> to vector<8x64xf32>
    %c8_233 = arith.constant 8 : index
    %c0_234 = arith.constant 0 : index
    %234 = vector.load %arg19[%c8_233, %c0_234] : memref<32x64xf32, #tpu.memory_space<vmem>>, vector<8x64xf32>
    tpu.vector_store %arg19[%c8_233, %c0_234], %233 {strides = array<i32>} : memref<32x64xf32, #tpu.memory_space<vmem>>, vector<8x64xf32>,
    %235 = vector.extract_strided_slice %230 {offsets = [0, 128], sizes = [8, 64], strides = [1, 1]} : vector<8x256xf32> to vector<8x64xf32>
    %c16_235 = arith.constant 16 : index
    %c0_236 = arith.constant 0 : index
    %236 = vector.load %arg19[%c16_235, %c0_236] : memref<32x64xf32, #tpu.memory_space<vmem>>, vector<8x64xf32>
    tpu.vector_store %arg19[%c16_235, %c0_236], %235 {strides = array<i32>} : memref<32x64xf32, #tpu.memory_space<vmem>>, vector<8x64xf32>,
    %237 = vector.extract_strided_slice %230 {offsets = [0, 192], sizes = [8, 64], strides = [1, 1]} : vector<8x256xf32> to vector<8x64xf32>
    %c24_237 = arith.constant 24 : index
    %c0_238 = arith.constant 0 : index
    %238 = vector.load %arg19[%c24_237, %c0_238] : memref<32x64xf32, #tpu.memory_space<vmem>>, vector<8x64xf32>
    tpu.vector_store %arg19[%c24_237, %c0_238], %237 {strides = array<i32>} : memref<32x64xf32, #tpu.memory_space<vmem>>, vector<8x64xf32>,
    %c0_239 = arith.constant 0 : index
    %c0_240 = arith.constant 0 : index
    %239 = vector.load %arg6[%c0_239, %c0_240] : memref<16x32xf32, #tpu.memory_space<vmem>>, vector<16x32xf32>
    %c0_241 = arith.constant 0 : index
    %c0_242 = arith.constant 0 : index
    %240 = vector.load %arg19[%c0_241, %c0_242] : memref<32x64xf32, #tpu.memory_space<vmem>>, vector<32x64xf32>
    %cst_243 = arith.constant dense<0.000000e+00> : vector<16x64xf32>
    %241 = tpu.matmul %239, %240, %cst_243 {dimension_numbers = #tpu.dot_dimension_numbers<[1], [0], [0], [1], [0, 0, 1, 1], [], []>} : vector<16x32xf32>, vector<32x64xf32>, vector<16x64xf32> -> vector<16x64xf32>
    %c0_244 = arith.constant 0 : index
    %c0_245 = arith.constant 0 : index
    %242 = vector.load %arg12[%c0_244, %c0_245] : memref<16x1xf32, #tpu.memory_space<vmem>>, vector<16x1xf32>
    %243 = vector.broadcast %242 : vector<16x1xf32> to vector<16x64xf32>
    %244 = arith.addf %241, %243 : vector<16x64xf32>
    %cst_246 = arith.constant 0.000000e+00 : f32
    %245 = vector.broadcast %cst_246 : f32 to vector<16x64xf32>
    %246 = arith.cmpf oge, %244, %245 : vector<16x64xf32>
    %cst_247 = arith.constant 1.000000e-01 : f32
    %247 = vector.broadcast %cst_247 : f32 to vector<16x64xf32>
    %248 = arith.mulf %247, %244 : vector<16x64xf32>
    %249 = arith.select %246, %244, %248 : vector<16x64xi1>, vector<16x64xf32>
    %c0_248 = arith.constant 0 : index
    %c0_249 = arith.constant 0 : index
    %c0_250 = arith.constant 0 : index
    %250 = vector.load %arg15[%c0_248, %c0_249, %c0_250] : memref<1x16x64xf32, #tpu.memory_space<vmem>>, vector<1x16x64xf32>
    %251 = vector.shape_cast %250 : vector<1x16x64xf32> to vector<16x64xf32>
    %252 = vector.shape_cast %249 : vector<16x64xf32> to vector<1x16x64xf32>
    tpu.vector_store %arg15[%c0_248, %c0_249, %c0_250], %252 {strides = array<i32>} : memref<1x16x64xf32, #tpu.memory_space<vmem>>, vector<1x16x64xf32>,
    return
  }
  func.func @transform_0(%arg0: i32) -> (i32, i32, i32) {
    %c0_i32 = arith.constant 0 : i32
    %c0_i32_0 = arith.constant 0 : i32
    %c0_i32_1 = arith.constant 0 : i32
    return %arg0, %c0_i32, %c0_i32_0 : i32, i32, i32
  }
  func.func @transform_1(%arg0: i32) -> (i32, i32) {
    %c0_i32 = arith.constant 0 : i32
    %c0_i32_0 = arith.constant 0 : i32
    %c0_i32_1 = arith.constant 0 : i32
    return %c0_i32, %c0_i32_0 : i32, i32
  }
  func.func @transform_2(%arg0: i32) -> (i32, i32) {
    %c0_i32 = arith.constant 0 : i32
    %c0_i32_0 = arith.constant 0 : i32
    %c0_i32_1 = arith.constant 0 : i32
    return %c0_i32, %c0_i32_0 : i32, i32
  }
  func.func @transform_3(%arg0: i32) -> (i32, i32) {
    %c0_i32 = arith.constant 0 : i32
    %c0_i32_0 = arith.constant 0 : i32
    %c0_i32_1 = arith.constant 0 : i32
    return %c0_i32, %c0_i32_0 : i32, i32
  }
  func.func @transform_4(%arg0: i32) -> (i32, i32) {
    %c0_i32 = arith.constant 0 : i32
    %c0_i32_0 = arith.constant 0 : i32
    %c0_i32_1 = arith.constant 0 : i32
    return %c0_i32, %c0_i32_0 : i32, i32
  }
  func.func @transform_5(%arg0: i32) -> (i32, i32) {
    %c0_i32 = arith.constant 0 : i32
    %c0_i32_0 = arith.constant 0 : i32
    %c0_i32_1 = arith.constant 0 : i32
    return %c0_i32, %c0_i32_0 : i32, i32
  }
  func.func @transform_6(%arg0: i32) -> (i32, i32) {
    %c0_i32 = arith.constant 0 : i32
    %c0_i32_0 = arith.constant 0 : i32
    %c0_i32_1 = arith.constant 0 : i32
    return %c0_i32, %c0_i32_0 : i32, i32
  }
  func.func @transform_7(%arg0: i32) -> (i32, i32) {
    %c0_i32 = arith.constant 0 : i32
    %c0_i32_0 = arith.constant 0 : i32
    %c0_i32_1 = arith.constant 0 : i32
    return %c0_i32, %c0_i32_0 : i32, i32
  }
  func.func @transform_8(%arg0: i32) -> (i32, i32) {
    %c0_i32 = arith.constant 0 : i32
    %c0_i32_0 = arith.constant 0 : i32
    %c0_i32_1 = arith.constant 0 : i32
    return %c0_i32, %c0_i32_0 : i32, i32
  }
  func.func @transform_9(%arg0: i32) -> (i32, i32) {
    %c0_i32 = arith.constant 0 : i32
    %c0_i32_0 = arith.constant 0 : i32
    %c0_i32_1 = arith.constant 0 : i32
    return %c0_i32, %c0_i32_0 : i32, i32
  }
  func.func @transform_10(%arg0: i32) -> (i32, i32) {
    %c0_i32 = arith.constant 0 : i32
    %c0_i32_0 = arith.constant 0 : i32
    %c0_i32_1 = arith.constant 0 : i32
    return %c0_i32, %c0_i32_0 : i32, i32
  }
  func.func @transform_11(%arg0: i32) -> (i32, i32) {
    %c0_i32 = arith.constant 0 : i32
    %c0_i32_0 = arith.constant 0 : i32
    %c0_i32_1 = arith.constant 0 : i32
    return %c0_i32, %c0_i32_0 : i32, i32
  }
  func.func @transform_12(%arg0: i32) -> (i32, i32, i32) {
    %c0_i32 = arith.constant 0 : i32
    %c0_i32_0 = arith.constant 0 : i32
    %c0_i32_1 = arith.constant 0 : i32
    return %arg0, %c0_i32, %c0_i32_0 : i32, i32, i32
  }
  func.func @transform_13(%arg0: i32) -> (i32, i32, i32) {
    %c0_i32 = arith.constant 0 : i32
    %c0_i32_0 = arith.constant 0 : i32
    %c0_i32_1 = arith.constant 0 : i32
    return %arg0, %c0_i32, %c0_i32_0 : i32, i32, i32
  }
  func.func @transform_14(%arg0: i32) -> (i32, i32, i32) {
    %c0_i32 = arith.constant 0 : i32
    %c0_i32_0 = arith.constant 0 : i32
    %c0_i32_1 = arith.constant 0 : i32
    return %arg0, %c0_i32, %c0_i32_0 : i32, i32, i32
  }
}

</mosaic_0001>

<bundles_post_ra>
// kernel: tile.8
= control target key start
LH: loop header
LB: loop body
LE: loop exit
PB: predicated region body
PF: predicated region fallthrough
CT: control target
= control target key end

     0   :  { %s22_s0 = inlined_call_operand.vmem [shape: f32[4], index: 0, kind: input, shape index: {}]   ;;  %s23_s1 = inlined_call_operand.vmem [shape: f32[4,4], index: 1, kind: output, shape index: {}]  }
   0x1   :  { %v4_v0 = vld [vmem:[%s22_s0] ss:$0 sm:$0xff] }
   0x2   :  { %5 = vst [vmem:[%s23_s1] sm:$0xf] %v4_v0 }

// kernel: tile.0
= control target key start
LH: loop header
LB: loop body
LE: loop exit
PB: predicated region body
PF: predicated region fallthrough
CT: control target
= control target key end

     0   :  { %s34_s8 = smov 125   ;;  %s35_s9 = smov 126   ;;  %vm7_vm0 = vcmask 7168   ;;  %s61_s0 = inlined_call_operand.vmem [shape: f32[4,4], index: 0, kind: input, shape index: {}]   ;;  %s62_s1 = inlined_call_operand.vmem [shape: f32[16,1], index: 1, kind: output, shape index: {}]  }
   0x1   :  { %v4_v0 = vld [vmem:[%s61_s0] sm:$0xf]  ;;  %s33_s0 = smov 127  }
   0x2   :  { %5 = vst [vmem:[#allocation0] sm:$0xf] %v4_v0 }
   0x9   :  { %v9_v1 = vld [vmem:[#allocation0] sm:$0xf]  }
   0xa   :  { %v21_v2 = vld [vmem:[#allocation0] sm:$0xf]   ;;  %10 = vrot.lane.b32.xlu0 %v9_v1, %s33_s0 }
   0xb   :  { %22 = vrot.lane.b32.xlu1 %v21_v2, %s34_s8  ;;  %v15_v3 = vld [vmem:[#allocation0] sm:$0xf]  }
   0xc   :  { %v6_v4 = vld [vmem:[#allocation0] sm:$0xf]  }
   0xd   :  { %8 = vst.msk [vmem:[%s62_s1] ss:$4 sm:$0xf] %vm7_vm0, %v6_v4  }
  0x12   :  { %16 = vrot.lane.b32.xlu0 %v15_v3, %s35_s9 }
  0x7c   :  { %v11_v5 = vpop.permute.xlu0 %10  }
  0x7d   :  { %v23_v6 = vpop.permute.xlu1 %22   ;;  %27 = vst.msk [vmem:[%s62_s1 + $0x1] ss:$4 sm:$0xf] %vm7_vm0, %v11_v5  }
  0x7e   :  { %29 = vst.msk [vmem:[%s62_s1 + $0x3] ss:$4 sm:$0xf] %vm7_vm0, %v23_v6  }
  0x84   :  { %v17_v7 = vpop.permute.xlu0 %16  }
  0x85   :  { %28 = vst.msk [vmem:[%s62_s1 + $0x2] ss:$4 sm:$0xf] %vm7_vm0, %v17_v7  }

// kernel: block_fwd_nchw.1
= control target key start
LH: loop header
LB: loop body
LE: loop exit
PB: predicated region body
PF: predicated region fallthrough
CT: control target
= control target key end

     0   :  { %s2500_s29 = smov 0   ;;  %s3268_s0 = inlined_call_operand.vmem [shape: f32[2,8,400], index: 0, kind: input, shape index: {}]   ;;  %s3269_s1 = inlined_call_operand.vmem [shape: f32[8,152], index: 1, kind: input, shape index: {}]   ;;  %s3270_s2 = inlined_call_operand.vmem [shape: f32[8,72], index: 2, kind: input, shape index: {}]   ;;  %s3271_s3 = inlined_call_operand.vmem [shape: f32[8,72], index: 3, kind: input, shape index: {}]   ;;  %s3272_s4 = inlined_call_operand.vmem [shape: f32[16,8], index: 4, kind: input, shape index: {}]   ;;  %s3273_s5 = inlined_call_operand.vmem [shape: f32[16,32], index: 5, kind: input, shape index: {}]   ;;  %s3274_s6 = inlined_call_operand.vmem [shape: f32[256,256], index: 6, kind: input, shape index: {}]   ;;  %s3275_s7 = inlined_call_operand.vmem [shape: f32[8,1], index: 7, kind: input, shape index: {}]   ;;  %s3276_s8 = inlined_call_operand.vmem [shape: f32[8,1], index: 8, kind: input, shape index: {}]   ;;  %s3277_s9 = inlined_call_operand.vmem [shape: f32[8,1], index: 9, kind: input, shape index: {}]   ;;  %s3278_s10 = inlined_call_operand.vmem [shape: f32[16,1], index: 10, kind: input, shape index: {}]   ;;  %s3279_s11 = inlined_call_operand.vmem [shape: f32[16,1], index: 11, kind: input, shape index: {}]   ;;  %s3280_s12 = inlined_call_operand.vmem [shape: f32[2,8,256], index: 12, kind: output, shape index: {0}]   ;;  %s3281_s13 = inlined_call_operand.vmem [shape: f32[2,16,256], index: 13, kind: output, shape index: {1}]   ;;  %s3282_s14 = inlined_call_operand.vmem [shape: f32[2,16,64], index: 14, kind: output, shape index: {2}]  }
   0x1 LB: > { %s2308_s30 = sadd.s32 4294967295, %s2391_s29   ;;  %p2312_p0 = scmp.ge.s32.totalorder %s2391_s29, 1  ;;  %s2391_s29 = sphi %s2500_s29, %s25_s29  }
   0x2   : > { %p417_p1 = scmp.lt.s32.totalorder %s2391_s29, 3 }
   0x4   : > { %p418_p2 = pnand %p2312_p0, %p417_p1 }
   0x5   : > { %p473_p3 = scmp.lt.s32.totalorder (!%p418_p2), %s2308_s30, 1  ;;  %s3285_s19 = smov (!%p418_p2), 84  }
   0x6   : > { %421 = sbr.rel (%p418_p2) target bundleno = 1880 (0x758), region = 68  ;;  %s2394_s20 = smov (!%p418_p2), 86  }
   0x7   : > { %s2395_s21 = smov (!%p418_p2), 88   ;;  %s3284_s22 = smov (!%p418_p2), 124  }
   0x8   : > { %s2397_s23 = smov (!%p418_p2), 126   ;;  %s2398_s24 = smov (!%p418_p2), 65  }
   0x9   : > { %s2399_s25 = smov (!%p418_p2), 66   ;;  %s2400_s26 = smov (!%p418_p2), 67  }
   0xa   : > { %s2401_s27 = smov (!%p418_p2), 85   ;;  %s2402_s28 = smov (!%p418_p2), 44  }
   0xb   : > { %s3311_s30 = smov (!%p473_p3, %s2308_s30), 1  ;;  %vm622_vm0 = vcmask 490496   ;;  %s2403_s16 = smov 46   ;;  %vm872_vm1 = vcmask 719872   ;;  %vm913_vm2 = vcmask 687104   ;;  %vm614_vm3 = vcmask 703488  }
   0xc   : > { %s3283_s15 = sshll.u32 %s3311_s30, 5  ;;  %s2404_s17 = smov 87   ;;  %vm851_vm4 = vcmask 1014784   ;;  %vm830_vm5 = vcmask 1031168   ;;  %vm803_vm6 = vcmask 531456   ;;  %vm990_vm7 = vcmask 359424  }
   0xd   : > { %s2516_s18 = scalar_lea.vmem %s3268_s0, %s3283_s15  ;;  %s2406_s15 = smov 105   ;;  %vm782_vm8 = vcmask 539648   ;;  %vm964_vm9 = vcmask 375808   ;;  %vm938_vm10 = vcmask 392192   ;;  %vm761_vm11 = vcmask 547840  }
   0xe   : > { %v2519_v0 = vld [vmem:[%s2516_s18 + $0x8] sm:$0xff]  ;;  %v2522_v1 = vld [vmem:[%s2516_s18] sm:$0xff]  ;;  %v2531_v2 = vld [vmem:[%s2516_s18 + $0x10] sm:$0xff]  ;;  %vm740_vm12 = vcmask 695296   ;;  %vm1065_vm13 = vcmask 195584   ;;  %vm3288_vm14 = vcmask 711680  }
   0xf   : > { %909 = vrot.lane.b32.xlu0 %v2519_v0, %s3285_s19  ;;  %889 = vrot.lane.b32.xlu1 %v2519_v0, %s2394_s20  ;;  %817 = vst.msk [vmem:[#allocation4 + $0x100] sm:$0xff] %vm622_vm0, %v2531_v2  ;;  %v951_v23 = vld [vmem:[%s2516_s18 + $0x18] sm:$0xff]  ;;  %vm3289_vm15 = vcmask 859136   ;;  %s2417_s18 = smov 80  }
  0x10   : > { %868 = vrot.lane.b32.xlu2 %v2519_v0, %s2395_s21 }
  0x16   : > { %v1034_v33 = vld [vmem:[#allocation4 + $0x100] sm:$0xff] }
  0x17   : > { %911 = vrot.lane.b32.xlu0 %v2531_v2, %s3285_s19  ;;  %891 = vrot.lane.b32.xlu1 %v2531_v2, %s2394_s20 }
  0x18   : > { %870 = vrot.lane.b32.xlu2 %v2531_v2, %s2395_s21 }
  0x1f   : > { %849 = vrot.lane.b32.xlu1 %v2531_v2, %s3284_s22  ;;  %847 = vrot.lane.b32.xlu0 %v2519_v0, %s3284_s22 }
  0x20   : > { %907 = vrot.lane.b32.xlu2 %v2522_v1, %s3285_s19  ;;  %s2408_s19 = smov 107  }
  0x27   : > { %828 = vrot.lane.b32.xlu1 %v2531_v2, %s2397_s23  ;;  %826 = vrot.lane.b32.xlu0 %v2519_v0, %s2397_s23 }
  0x28   : > { %887 = vrot.lane.b32.xlu2 %v2522_v1, %s2394_s20 }
  0x2f   : > { %866 = vrot.lane.b32.xlu0 %v2522_v1, %s2395_s21  ;;  %799 = vrot.lane.b32.xlu1 %v2519_v0, %s2398_s24 }
  0x30   : > { %801 = vrot.lane.b32.xlu2 %v2531_v2, %s2398_s24 }
  0x37   : > { %845 = vrot.lane.b32.xlu0 %v2522_v1, %s3284_s22  ;;  %778 = vrot.lane.b32.xlu1 %v2519_v0, %s2399_s25  ;;  %s2407_s22 = smov 106  }
  0x38   : > { %780 = vrot.lane.b32.xlu2 %v2531_v2, %s2399_s25 }
  0x3f   : > { %824 = vrot.lane.b32.xlu0 %v2522_v1, %s2397_s23  ;;  %757 = vrot.lane.b32.xlu1 %v2519_v0, %s2400_s26  ;;  %s2405_s23 = smov 48  }
  0x40   : > { %759 = vrot.lane.b32.xlu2 %v2531_v2, %s2400_s26 }
  0x47   : > { %738 = vrot.lane.b32.xlu1 %v2531_v2, %s2401_s27  ;;  %736 = vrot.lane.b32.xlu0 %v2519_v0, %s2401_s27 }
  0x48   : > { %797 = vrot.lane.b32.xlu2 %v2522_v1, %s2398_s24 }
  0x4f   : > { %984 = vrot.lane.b32.xlu1 %v2519_v0, %s2402_s28  ;;  %982 = vrot.lane.b32.xlu0 %v2522_v1, %s2402_s28 }
  0x50   : > { %716 = vrot.lane.b32.xlu2 %v2519_v0, %s2394_s20 }
  0x57   : > { %776 = vrot.lane.b32.xlu1 %v2522_v1, %s2399_s25  ;;  %718 = vrot.lane.b32.xlu0 %v2531_v2, %s2394_s20 }
  0x58   : > { %956 = vrot.lane.b32.xlu2 %v2522_v1, %s2403_s16 }
  0x5f   : > { %958 = vrot.lane.b32.xlu0 %v2519_v0, %s2403_s16  ;;  %695 = vrot.lane.b32.xlu1 %v2519_v0, %s2404_s17 }
  0x60   : > { %697 = vrot.lane.b32.xlu2 %v2531_v2, %s2404_s17 }
  0x67   : > { %755 = vrot.lane.b32.xlu0 %v2522_v1, %s2400_s26  ;;  %930 = vrot.lane.b32.xlu1 %v2522_v1, %s2405_s23 }
  0x68   : > { %932 = vrot.lane.b32.xlu2 %v2519_v0, %s2405_s23 }
  0x6a   : > { %v2598_v3 = vpop.permute.xlu2 %868 }
  0x6f   : > { %986 = vrot.lane.b32.xlu0 %v2531_v2, %s2402_s28  ;;  %674 = vrot.lane.b32.xlu1 %v2519_v0, %s2406_s15 }
  0x70   : > { %676 = vrot.lane.b32.xlu2 %v2531_v2, %s2406_s15 }
  0x72   : > { %v871_v4 = vpop.permute.xlu2 %870 }
  0x73   : > { %v2608_v5 = vsel %vm872_vm1, %v2598_v3, %v871_v4  ;;  %880 = vst.msk [vmem:[#allocation4 + $0x148] sm:$0xff] %vm622_vm0, %v871_v4 }
  0x77   : > { %734 = vrot.lane.b32.xlu0 %v2522_v1, %s2401_s27  ;;  %960 = vrot.lane.b32.xlu1 %v2531_v2, %s2403_s16 }
  0x78   : > { %653 = vrot.lane.b32.xlu2 %v2519_v0, %s2407_s22 }
  0x7a   : > { %v908_v6 = vpop.permute.xlu2 %907  ;;  %v1043_v24 = vld [vmem:[#allocation4 + $0x148] sm:$0xff] }
  0x7f   : > { %714 = vrot.lane.b32.xlu1 %v2522_v1, %s2394_s20  ;;  %655 = vrot.lane.b32.xlu0 %v2531_v2, %s2407_s22 }
  0x80   : > { %934 = vrot.lane.b32.xlu2 %v2531_v2, %s2405_s23 }
  0x81   : > { %v910_v7 = vpop.permute.xlu0 %909  ;;  %v890_v8 = vpop.permute.xlu1 %889 }
  0x82   : > { %v914_v9 = vsel %vm913_vm2, %v908_v6, %v910_v7  ;;  %v888_v10 = vpop.permute.xlu2 %887 }
  0x83   : > { %v893_v11 = vsel %vm614_vm3, %v888_v10, %v890_v8  ;;  %1069 = vmatpush.msra.mxu0 %v914_v9 }
  0x85   : > { %1070 = vmatpush.msra.mxu0 %v893_v11 }
  0x87   : > { %634 = vrot.lane.b32.xlu1 %v2531_v2, %s2408_s19  ;;  %632 = vrot.lane.b32.xlu0 %v2519_v0, %s2408_s19 }
  0x88   : > { %693 = vrot.lane.b32.xlu2 %v2522_v1, %s2404_s17 }
  0x89   : > { %v912_v12 = vpop.permute.xlu0 %911  ;;  %v892_v13 = vpop.permute.xlu1 %891 }
  0x8a   : > { %v2632_v14 = vsel %vm913_vm2, %v910_v7, %v912_v12  ;;  %921 = vst.msk [vmem:[#allocation4 + $0x178] sm:$0xff] %vm622_vm0, %v912_v12  ;;  %v2636_v15 = vsel %vm614_vm3, %v890_v8, %v892_v13  ;;  %v802_v16 = vpop.permute.xlu2 %801  ;;  %vm3286_vm2 = vcmask 875520  }
  0x8b   : > { %900 = vst.msk [vmem:[#allocation4 + $0x160] sm:$0xff] %vm622_vm0, %v892_v13 }
  0x8c   : > { %811 = vst.msk [vmem:[#allocation4 + $0xe8] sm:$0xff] %vm622_vm0, %v802_v16 }
  0x8f   : > { %612 = vrot.lane.b32.xlu1 %v2531_v2, %s2394_s20  ;;  %610 = vrot.lane.b32.xlu0 %v2519_v0, %s2394_s20 }
  0x90   : > { %672 = vrot.lane.b32.xlu2 %v2522_v1, %s2406_s15 }
  0x91   : > { %v850_v17 = vpop.permute.xlu1 %849  ;;  %v848_v18 = vpop.permute.xlu0 %847  ;;  %v1049_v19 = vld [vmem:[#allocation4 + $0x178] sm:$0xff] }
  0x92   : > { %859 = vst.msk [vmem:[#allocation4 + $0x130] sm:$0xff] %vm622_vm0, %v850_v17  ;;  %v2648_v20 = vsel %vm851_vm4, %v848_v18, %v850_v17  ;;  %v2650_v21 = vpop.permute.xlu2 %780  ;;  %1149 = vmatpush.msra.mxu1 %v1049_v19  ;;  %v1046_v22 = vld [vmem:[#allocation4 + $0x160] sm:$0xff] }
  0x93   : > { %790 = vst.msk [vmem:[#allocation4 + $0xd0] sm:$0xff] %vm622_vm0, %v2650_v21  ;;  %v1031_v38 = vld [vmem:[#allocation4 + $0xe8] sm:$0xff] }
  0x94   : > { %1150 = vmatpush.msra.mxu1 %v1046_v22 }
  0x96   : > { %1151 = vmatpush.msra.mxu1 %v1043_v24 }
  0x97   : > { %651 = vrot.lane.b32.xlu1 %v2522_v1, %s2407_s22  ;;  %988 = vrot.lane.b32.xlu0 %v951_v23, %s2402_s28 }
  0x98   : > { %962 = vrot.lane.b32.xlu2 %v951_v23, %s2403_s16  ;;  %s2410_s16 = smov 42  }
  0x99   : > { %v829_v25 = vpop.permute.xlu1 %828  ;;  %v827_v26 = vpop.permute.xlu0 %826  ;;  %v1040_v27 = vld [vmem:[#allocation4 + $0x130] sm:$0xff] }
  0x9a   : > { %838 = vst.msk [vmem:[#allocation4 + $0x118] sm:$0xff] %vm622_vm0, %v829_v25  ;;  %v2661_v28 = vsel %vm830_vm5, %v827_v26, %v829_v25  ;;  %v2663_v29 = vpop.permute.xlu2 %759  ;;  %1152 = vmatpush.msra.mxu1 %v1040_v27  ;;  %v1028_v39 = vld [vmem:[#allocation4 + $0xd0] sm:$0xff] }
  0x9b   : > { %769 = vst.msk [vmem:[#allocation4 + $0xb8] sm:$0xff] %vm622_vm0, %v2663_v29 }
  0x9f   : > { %936 = vrot.lane.b32.xlu1 %v951_v23, %s2405_s23  ;;  %630 = vrot.lane.b32.xlu0 %v2522_v1, %s2408_s19  ;;  %s2424_s23 = smov 64  }
  0xa0   : > { %608 = vrot.lane.b32.xlu2 %v2522_v1, %s2394_s20 }
  0xa1   : > { %v867_v30 = vpop.permute.xlu0 %866  ;;  %v800_v31 = vpop.permute.xlu1 %799  ;;  %v1037_v32 = vld [vmem:[#allocation4 + $0x118] sm:$0xff] }
  0xa2   : > { %v873_v34 = vsel %vm872_vm1, %v867_v30, %v2598_v3  ;;  %v2675_v35 = vsel %vm803_vm6, %v800_v31, %v802_v16  ;;  %v798_v36 = vpop.permute.xlu2 %797  ;;  %1153 = vmatpush.msra.mxu1 %v1037_v32  ;;  %v1025_v40 = vld [vmem:[#allocation4 + $0xb8] sm:$0xff]  ;;  %vm3287_vm1 = vcmask 867328  }
  0xa3   : > { %v804_v37 = vsel %vm803_vm6, %v798_v36, %v800_v31  ;;  %1071 = vmatpush.msra.mxu0 %v873_v34 }
  0xa4   : > { %1154 = vmatpush.msra.mxu1 %v1034_v33 }
  0xa6   : > { %1155 = vmatpush.msra.mxu1 %v1031_v38  ;;  %v1059_v38 = vld [vmem:[%s3275_s7] sm:$0xff] }
  0xa8   : > { %1156 = vmatpush.msra.mxu1 %v1028_v39  ;;  %v2409_v39 = vmov 0  }
  0xa9   : > { %v846_v41 = vpop.permute.xlu0 %845  ;;  %v2678_v42 = vpop.permute.xlu1 %778  ;;  %2382 = vset.pattern.permute.xlu0 %v2409_v39  ;;  %2383 = vset.pattern.permute.xlu2 %v2409_v39 }
  0xaa   : > { %v852_v43 = vsel %vm851_vm4, %v846_v41, %v848_v18  ;;  %v2681_v44 = vpop.permute.xlu2 %716  ;;  %1157 = vmatpush.msra.mxu1 %v1025_v40  ;;  %1062 = vperm.xlu0 %2382, %v1059_v38  }
  0xab   : > { %1072 = vmatpush.msra.mxu0 %v852_v43  ;;  %2384 = vset.pattern.permute.xlu1 %v2409_v39  ;;  %v1000_v43 = vld [vmem:[%s3269_s1] sm:$0xff] }
  0xb1   : > { %v825_v45 = vpop.permute.xlu0 %824  ;;  %v2683_v46 = vpop.permute.xlu1 %757 }
  0xb2   : > { %v831_v47 = vsel %vm830_vm5, %v825_v45, %v827_v26  ;;  %v957_v48 = vpop.permute.xlu2 %956 }
  0xb3   : > { %1073 = vmatpush.msra.mxu0 %v831_v47 }
  0xb5   : > { %1074 = vmatpush.msra.mxu0 %v2522_v1 }
  0xb7   : > { %1075 = vmatpush.msra.mxu0 %v804_v37 }
  0xb9   : > { %v2687_v49 = vpop.permute.xlu1 %738  ;;  %v2689_v50 = vpop.permute.xlu0 %736 }
  0xba   : > { %748 = vst.msk [vmem:[#allocation4 + $0xa0] sm:$0xff] %vm622_vm0, %v2687_v49  ;;  %v2693_v51 = vpop.permute.xlu2 %697  ;;  %v742_v22 = vsel %vm740_vm12, %v2689_v50, %v2687_v49 }
  0xbb   : > { %707 = vst.msk [vmem:[#allocation4 + $0x70] sm:$0xff] %vm622_vm0, %v2693_v51 }
  0xc1   : > { %v985_v52 = vpop.permute.xlu1 %984  ;;  %v983_v53 = vpop.permute.xlu0 %982  ;;  %v1022_v54 = vld [vmem:[#allocation4 + $0xa0] sm:$0xff] }
  0xc2   : > { %v991_v55 = vsel %vm990_vm7, %v983_v53, %v985_v52  ;;  %v933_v56 = vpop.permute.xlu2 %932  ;;  %1158 = vmatpush.msra.mxu1 %v1022_v54  ;;  %v1016_v1 = vld [vmem:[#allocation4 + $0x70] sm:$0xff] }
  0xc3   : > { %1102 = vmatpush.msra.mxu2 %v991_v55 }
  0xc9   : > { %v777_v57 = vpop.permute.xlu1 %776  ;;  %v719_v58 = vpop.permute.xlu0 %718 }
  0xca   : > { %v783_v59 = vsel %vm782_vm8, %v777_v57, %v2678_v42  ;;  %727 = vst.msk [vmem:[#allocation4 + $0x88] sm:$0xff] %vm622_vm0, %v719_v58  ;;  %v2701_v60 = vpop.permute.xlu2 %676  ;;  %v721_v23 = vsel %vm614_vm3, %v2681_v44, %v719_v58 }
  0xcb   : > { %686 = vst.msk [vmem:[#allocation4 + $0x58] sm:$0xff] %vm622_vm0, %v2701_v60  ;;  %1076 = vmatpush.msra.mxu0 %v783_v59  ;;  %v493_v59 = vlaneseq }
  0xd1   : > { %v959_v61 = vpop.permute.xlu0 %958  ;;  %v2705_v62 = vpop.permute.xlu1 %695  ;;  %v1019_v63 = vld [vmem:[#allocation4 + $0x88] sm:$0xff] }
  0xd2   : > { %v965_v2 = vsel %vm964_vm9, %v957_v48, %v959_v61  ;;  %v2708_v3 = vpop.permute.xlu2 %653  ;;  %1159 = vmatpush.msra.mxu1 %v1019_v63  ;;  %v1013_v4 = vld [vmem:[#allocation4 + $0x58] sm:$0xff]  ;;  %v701_v24 = vsel %vm3288_vm14, %v2705_v62, %v2693_v51 }
  0xd3   : > { %1103 = vmatpush.msra.mxu2 %v965_v2 }
  0xd4   : > { %1160 = vmatpush.msra.mxu1 %v1016_v1 }
  0xd6   : > { %1161 = vmatpush.msra.mxu1 %v1013_v4 }
  0xd9   : > { %v756_v6 = vpop.permute.xlu0 %755  ;;  %v931_v7 = vpop.permute.xlu1 %930 }
  0xda   : > { %v762_v8 = vsel %vm761_vm11, %v756_v6, %v2683_v46  ;;  %v939_v9 = vsel %vm938_vm10, %v931_v7, %v933_v56  ;;  %v2713_v10 = vpop.permute.xlu2 %934 }
  0xdb   : > { %v940_v11 = vsel %vm938_vm10, %v933_v56, %v2713_v10  ;;  %1077 = vmatpush.msra.mxu0 %v762_v8  ;;  %1104 = vmatpush.msra.mxu2 %v939_v9 }
  0xdd   : > { %1109 = vmatpush.msrb.mxu2 %v2632_v14 }
  0xdf   : > { %1110 = vmatpush.msrb.mxu2 %v2636_v15 }
  0xe1   : > { %1111 = vmatpush.msrb.mxu2 %v2608_v5  ;;  %v2720_v12 = vpop.permute.xlu0 %986  ;;  %v675_v13 = vpop.permute.xlu1 %674  ;;  %v784_v5 = vsel %vm782_vm8, %v2678_v42, %v2650_v21  ;;  %v2740_v21 = vld [vmem:[%s3269_s1 + $0x8] sm:$0xff] }
  0xe2   : > { %v992_v16 = vsel %vm990_vm7, %v985_v52, %v2720_v12  ;;  %v694_v17 = vpop.permute.xlu2 %693  ;;  %2321 = vmatmul.msk.f32.vlgmr.msra.gmra.mxu2 %vm1065_vm13, %v2740_v21 }
  0xe3   : > { %1112 = vmatpush.msrb.mxu2 %v2648_v20  ;;  %1142 = vmatpush.msra.mxu3 %v992_v16  ;;  %v700_v31 = vsel %vm3288_vm14, %v694_v17, %v2705_v62 }
  0xe5   : > { %1113 = vmatpush.msrb.mxu2 %v2661_v28 }
  0xe7   : > { %1114 = vmatpush.msrb.mxu2 %v2519_v0  ;;  %v763_v0 = vsel %vm761_vm11, %v2683_v46, %v2663_v29  ;;  %v680_v29 = vsel %vm3289_vm15, %v675_v13, %v2701_v60  ;;  %v2791_v60 = vand.u32 127, %v493_v59 }
  0xe9   : > { %1115 = vmatpush.msrb.mxu2 %v2675_v35  ;;  %v735_v14 = vpop.permute.xlu0 %734  ;;  %v961_v15 = vpop.permute.xlu1 %960 }
  0xea   : > { %v741_v18 = vsel %vm740_vm12, %v735_v14, %v2689_v50  ;;  %v966_v19 = vsel %vm964_vm9, %v959_v61, %v961_v15  ;;  %v673_v20 = vpop.permute.xlu2 %672  ;;  %v495_v61 = vadd.s32 128, %v2791_v60 }
  0xeb   : > { %1116 = vmatpush.msrb.mxu2 %v784_v5  ;;  %1078 = vmatpush.msra.mxu0 %v741_v18  ;;  %v679_v33 = vsel %vm3289_vm15, %v673_v20, %v675_v13 }
  0xec   : > { %1143 = vmatpush.msra.mxu3 %v966_v19  ;;  %v529_v62 = vand.u32 65535, %v495_v61  ;;  %v530_v63 = vshrl.u32 %v495_v61, 16  ;;  %v500_v19 = vand.u32 65535, %v2791_v60 }
  0xed   : > { %1117 = vmatpush.msrb.mxu2 %v763_v0 }
  0xee   : > { %1144 = vmatpush.msra.mxu3 %v940_v11  ;;  %v533_v1 = vmul.u32 52428, %v529_v62  ;;  %v532_v2 = vmul.u32 52429, %v529_v62  ;;  %v535_v6 = vmul.u32 52428, %v530_v63 }
  0xef   : > { %1118 = vmatpush.msrb.mxu2 %v742_v22  ;;  %2322 = vmatmul.msk.f32.vlgmr.msra.gmra.mxu3 %vm1065_vm13, %v2740_v21 }
  0xf0   : > { %v536_v4 = vshll.u32 %v533_v1, 16  ;;  %v537_v11 = vshrl.u32 %v533_v1, 16 }
  0xf1   : > { %1119 = vmatpush.msrb.mxu2 %v721_v23  ;;  %v715_v25 = vpop.permute.xlu1 %714  ;;  %v656_v26 = vpop.permute.xlu0 %655  ;;  %v501_v23 = vshrl.u32 %v2791_v60, 16 }
  0xf2   : > { %v720_v27 = vsel %vm614_vm3, %v715_v25, %v2681_v44  ;;  %665 = vst.msk [vmem:[#allocation4 + $0x40] sm:$0xff] %vm622_vm0, %v656_v26  ;;  %v963_v28 = vpop.permute.xlu2 %962  ;;  %v659_v32 = vsel %vm3287_vm1, %v2708_v3, %v656_v26  ;;  %vm540_vm4 = vc.u32 %v532_v2, %v536_v4  ;;  %v542_v8 = vadd.s32 %v536_v4, %v532_v2 }
  0xf3   : > { %1120 = vmatpush.msrb.mxu2 %v701_v24  ;;  %v967_v30 = vsel %vm964_vm9, %v961_v15, %v963_v28  ;;  %1079 = vmatpush.msra.mxu0 %v720_v27  ;;  %v541_v9 = vsel %vm540_vm4, 1, %v2409_v39  ;;  %v504_v24 = vmul.u32 52428, %v500_v19 }
  0xf4   : > { %973 = vst.msk [vmem:[#allocation4 + $0x1a8] sm:$0xff] %vm622_vm0, %v967_v30  ;;  %v503_v30 = vmul.u32 52429, %v500_v19 }
  0xf5   : > { %1121 = vmatpush.msrb.mxu2 %v680_v29  ;;  %1080 = vmatpush.msra.mxu0 %v700_v31 }
  0xf7   : > { %1122 = vmatpush.msrb.mxu2 %v659_v32  ;;  %1081 = vmatpush.msra.mxu0 %v679_v33  ;;  %v505_v32 = vmul.u32 52429, %v501_v23  ;;  %v507_v33 = vshll.u32 %v504_v24, 16 }
  0xf9   : > { %v635_v34 = vpop.permute.xlu1 %634  ;;  %v633_v35 = vpop.permute.xlu0 %632  ;;  %v1010_v36 = vld [vmem:[#allocation4 + $0x40] sm:$0xff]  ;;  %v513_v38 = vadd.s32 %v507_v33, %v503_v30  ;;  %v510_v62 = vshrl.u32 %v505_v32, 16 }
  0xfa   : > { %644 = vst.msk [vmem:[#allocation4 + $0x28] sm:$0xff] %vm622_vm0, %v635_v34  ;;  %v638_v37 = vsel %vm3286_vm2, %v633_v35, %v635_v34  ;;  %1162 = vmatpush.msra.mxu1 %v1010_v36  ;;  %v609_v50 = vpop.permute.xlu2 %608 }
  0xfb   : > { %1123 = vmatpush.msrb.mxu2 %v638_v37  ;;  %v1055_v57 = vld [vmem:[#allocation4 + $0x1a8] sm:$0xff]  ;;  %v509_v37 = vshll.u32 %v505_v32, 16 }
 0x101   : > { %v613_v40 = vpop.permute.xlu1 %612  ;;  %v611_v41 = vpop.permute.xlu0 %610  ;;  %v1007_v42 = vld [vmem:[#allocation4 + $0x28] sm:$0xff] }
 0x102   : > { %623 = vst.msk [vmem:[#allocation4 + $0x10] sm:$0xff] %vm622_vm0, %v613_v40  ;;  %v616_v44 = vsel %vm614_vm3, %v611_v41, %v613_v40  ;;  %1163 = vmatpush.msra.mxu1 %v1007_v42  ;;  %v615_v56 = vsel %vm614_vm3, %v609_v50, %v611_v41 }
 0x103   : > { %1124 = vmatpush.msrb.mxu2 %v616_v44 }
 0x104   : > { %1125 = vmatmul.f32.vlgmr.msrb.gmra.mxu2 %v1000_v43 }
 0x109   : > { %v652_v45 = vpop.permute.xlu1 %651  ;;  %v989_v46 = vpop.permute.xlu0 %988  ;;  %v1004_v47 = vld [vmem:[#allocation4 + $0x10] sm:$0xff] }
 0x10a   : > { %v658_v48 = vsel %vm3287_vm1, %v652_v45, %v2708_v3  ;;  %v993_v49 = vsel %vm990_vm7, %v2720_v12, %v989_v46  ;;  %1164 = vmatpush.msra.mxu1 %v1004_v47  ;;  %v534_v3 = vmul.u32 52429, %v530_v63  ;;  %v543_v12 = vadd.s32 %v541_v9, %v535_v6 }
 0x10b   : > { %999 = vst.msk [vmem:[#allocation4 + $0x1c0] sm:$0xff] %vm622_vm0, %v993_v49  ;;  %1082 = vmatpush.msra.mxu0 %v658_v48  ;;  %1165 = vmatmul.f32.vlgmr.msra.gmra.mxu1 %v1000_v43 }
 0x10c   : > { %v538_v7 = vshll.u32 %v534_v3, 16  ;;  %v539_v17 = vshrl.u32 %v534_v3, 16 }
 0x10e   : > { %vm544_vm5 = vc.u32 %v542_v8, %v538_v7 }
 0x10f   : > { %v545_v13 = vsel %vm544_vm5, 1, %v2409_v39  ;;  %vm515_vm5 = vc.u32 %v513_v38, %v509_v37 }
 0x110   : > { %v547_v5 = vadd.s32 %v545_v13, %v543_v12  ;;  %v516_v49 = vsel %vm515_vm5, 1, %v2409_v39 }
 0x111   : > { %v937_v51 = vpop.permute.xlu1 %936  ;;  %v631_v52 = vpop.permute.xlu0 %630 }
 0x112   : > { %v941_v53 = vsel %vm938_vm10, %v2713_v10, %v937_v51  ;;  %v637_v54 = vsel %vm3286_vm2, %v631_v52, %v633_v35  ;;  %v1058_v55 = vld [vmem:[#allocation4 + $0x1c0] sm:$0xff]  ;;  %v2796_v10 = vadd.s32 256, %v2791_v60  ;;  %v548_v18 = vadd.s32 %v547_v5, %v537_v11 }
 0x113   : > { %947 = vst.msk [vmem:[#allocation4 + $0x190] sm:$0xff] %vm622_vm0, %v941_v53  ;;  %1182 = vmatpush.msrb.mxu3 %v1058_v55  ;;  %1083 = vmatpush.msra.mxu0 %v637_v54  ;;  %vm511_vm10 = vc.u32 %v503_v30, %v507_v33  ;;  %v508_v53 = vshrl.u32 %v504_v24, 16 }
 0x114   : > { %v558_v16 = vand.u32 65535, %v2796_v10  ;;  %v559_v14 = vshrl.u32 %v2796_v10, 16  ;;  %v549_v22 = vadd.s32 %v548_v18, %v539_v17  ;;  %v512_v44 = vsel %vm511_vm10, 1, %v2409_v39 }
 0x115   : > { %1183 = vmatpush.msrb.mxu3 %v1055_v57  ;;  %1084 = vmatpush.msra.mxu0 %v615_v56 }
 0x116   : > { %1085 = vmatmul.f32.vlgmr.msra.gmra.mxu0 %v1000_v43  ;;  %v562_v15 = vmul.u32 52428, %v558_v16  ;;  %v561_v20 = vmul.u32 52429, %v558_v16  ;;  %v563_v0 = vmul.u32 52429, %v559_v14  ;;  %v550_v25 = vshrl.u32 %v549_v22, 4 }
 0x117   : > { %v564_v28 = vmul.u32 52428, %v559_v14  ;;  %v506_v43 = vmul.u32 52428, %v501_v23 }
 0x118   : > { %v567_v26 = vshll.u32 %v563_v0, 16  ;;  %v551_v31 = vmul.u32 20, %v550_v25  ;;  %v566_v41 = vshrl.u32 %v562_v15, 16  ;;  %v568_v46 = vshrl.u32 %v563_v0, 16 }
 0x119   : > { %v514_v48 = vadd.s32 %v512_v44, %v506_v43  ;;  %v2411_v0 = vmov 0.0  }
 0x11a   : > { %v1052_v58 = vld [vmem:[#allocation4 + $0x190] sm:$0xff]  ;;  %v552_v36 = vsub.s32 %v495_v61, %v551_v31  ;;  %1191 = vst [vmem:[#allocation2 + $0x10] sm:$0xff] %v2411_v0 }
 0x11b   : > { %1184 = vmatpush.msrb.mxu3 %v1052_v58  ;;  %v518_v54 = vadd.s32 %v516_v49, %v514_v48  ;;  %1189 = vst [vmem:[#allocation2] sm:$0xff] %v2411_v0 }
 0x11c   : > { %2323 = vmatmul.msk.f32.vlgmr.msrb.gmra.mxu3 %vm1065_vm13, %v2740_v21  ;;  %v565_v21 = vshll.u32 %v562_v15, 16  ;;  %vm585_vm13 = vcmp.ne.s32.totalorder %v552_v36, 0  ;;  %vm588_vm4 = vcmp.lt.s32.totalorder %v552_v36, 0  ;;  %v594_v45 = vadd.s32 20, %v552_v36  ;;  %v1063_v50 = vpop.permute.xlu0 %1062  ;;  %1504 = vst [vmem:[#allocation3] sm:$0xff] %v2411_v0 }
 0x11d   : > { %v519_v63 = vadd.s32 %v518_v54, %v508_v53  ;;  %1506 = vst [vmem:[#allocation3 + $0x10] sm:$0xff] %v2411_v0 }
 0x11e   : > { %vm569_vm7 = vc.u32 %v561_v20, %v565_v21  ;;  %v571_v27 = vadd.s32 %v565_v21, %v561_v20 }
 0x11f   : > { %v570_v29 = vsel %vm569_vm7, 1, %v2409_v39  ;;  %vm591_vm7 = vmand %vm588_vm4, %vm585_vm13  ;;  %v520_v2 = vadd.s32 %v519_v63, %v510_v62 }
 0x120   : > { %vm573_vm9 = vc.u32 %v571_v27, %v567_v26  ;;  %v572_v34 = vadd.s32 %v570_v29, %v564_v28  ;;  %v597_v51 = vsel %vm591_vm7, %v594_v45, %v552_v36 }
 0x121   : > { %v574_v35 = vsel %vm573_vm9, 1, %v2409_v39  ;;  %vm2807_vm9 = vcmp.lt.s32.totalorder %v597_v51, 16  ;;  %v521_v4 = vshrl.u32 %v520_v2, 4 }
 0x122   : > { %v576_v42 = vadd.s32 %v574_v35, %v572_v34 }
 0x123   : > { %v522_v6 = vmul.u32 20, %v521_v4 }
 0x124   : > { %v577_v47 = vadd.s32 %v576_v42, %v566_v41 }
 0x125   : > { %v523_v9 = vsub.s32 %v2791_v60, %v522_v6  ;;  %v1425_v6 = vld [vmem:[%s3276_s8] sm:$0xff] }
 0x126   : > { %v578_v52 = vadd.s32 %v577_v47, %v568_v46 }
 0x127   : > { %vm584_vm5 = vcmp.ne.s32.totalorder %v523_v9, 0  ;;  %vm587_vm7 = vcmp.lt.s32.totalorder %v523_v9, 0  ;;  %v593_v5 = vadd.s32 20, %v523_v9 }
 0x128   : > { %v579_v61 = vshrl.u32 %v578_v52, 4  ;;  %vm590_vm1 = vmand %vm587_vm7, %vm584_vm5  ;;  %vm3296_vm5 = vcmask 867328   ;;  %vm1431_vm7 = vcmask 588800  }
 0x129   : > { %v596_v60 = vsel %vm590_vm1, %v593_v5, %v523_v9  ;;  %vm1212_vm1 = vcmask 1047888   ;;  %v1397_v5 = vld [vmem:[%s3270_s2] sm:$0xff] }
 0x12a   : > { %v580_v39 = vmul.u32 20, %v579_v61 }
 0x12c   : > { %v581_v3 = vsub.s32 %v2796_v10, %v580_v39 }
 0x12e   : > { %vm586_vm10 = vcmp.ne.s32.totalorder %v581_v3, 0  ;;  %vm589_vm13 = vcmp.lt.s32.totalorder %v581_v3, 0  ;;  %v595_v7 = vadd.s32 20, %v581_v3 }
 0x12f   : > { %vm592_vm4 = vmand %vm589_vm13, %vm586_vm10  ;;  %vm2823_vm10 = vcmp.lt.s32.totalorder %v596_v60, 16  ;;  %vm1206_vm13 = vcmask 343040  }
 0x130   : > { %v598_v12 = vsel %vm592_vm4, %v595_v7, %v581_v3  ;;  %vm1215_vm4 = vcmask 834560  }
 0x131   : > { %vm2816_vm2 = vcmp.lt.s32.totalorder %v598_v12, 16 }
 0x165   : > { %v1106_v40 = vpop.f32.mrf.mxu2 }
 0x172   : > { %v1146_v56 = vpop.f32.mrf.mxu3 }
 0x187   : > { %v1126_v55 = vpop.f32.mrf.mxu2 }
 0x188   : > { %v1127_v57 = vadd.f32 %v1126_v55, %v1063_v50  ;;  %v1166_v8 = vpop.f32.mrf.mxu1 }
 0x189   : > { %v1167_v11 = vadd.f32 %v1166_v8, %v1063_v50 }
 0x18a   : > { %v1147_v59 = vadd.f32 %v1146_v56, %v1127_v57 }
 0x18c   : > { %v1195_v1 = vsel %vm2807_vm9, %v1147_v59, 0.0 }
 0x18d   : > { %1202 = vrot.lane.b32.xlu2 %v1195_v1, %s2410_s16 }
 0x193   : > { %v1086_v13 = vpop.f32.mrf.mxu0 }
 0x194   : > { %v1087_v14 = vadd.f32 %v1086_v13, %v1063_v50 }
 0x196   : > { %v1107_v18 = vadd.f32 %v1106_v40, %v1087_v14 }
 0x198   : > { %v1194_v20 = vsel %vm2823_vm10, %v1107_v18, 0.0 }
 0x19f   : > { %v1186_v16 = vpop.f32.mrf.mxu3 }
 0x1a0   : > { %v1187_v10 = vadd.f32 %v1186_v16, %v1167_v11 }
 0x1a2   : > { %v1196_v15 = vsel %vm2816_vm2, %v1187_v10, 0.0 }
 0x1a3   : > { %1204 = vrot.lane.b32.xlu1 %v1196_v15, %s2410_s16 }
 0x1ab   : > { %1200 = vrot.lane.b32.xlu1 %v1194_v20, %s2410_s16 }
 0x1e7   : > { %v1203_v21 = vpop.permute.xlu2 %1202 }
 0x215   : > { %v1205_v22 = vpop.permute.xlu1 %1204 }
 0x216   : > { %v1208_v23 = vsel %vm1206_vm13, %v1203_v21, %v1205_v22 }
 0x217   : > { %1216 = vst.msk [vmem:[#allocation2 + $0x10] sm:$0xff] %vm1215_vm4, %v1208_v23 }
 0x21d   : > { %v1201_v24 = vpop.permute.xlu1 %1200 }
 0x21e   : > { %v1207_v25 = vsel %vm1206_vm13, %v1201_v24, %v1203_v21  ;;  %1213 = vst.msk [vmem:[#allocation2] sm:$0xff] %vm1212_vm1, %v1201_v24  ;;  %v1379_v27 = vld [vmem:[#allocation2 + $0x10] sm:$0xff] }
 0x21f   : > { %1385 = vrot.lane.b32.xlu0 %v1207_v25, %s2398_s24 }
 0x225   : > { %v1377_v26 = vld [vmem:[#allocation2] sm:$0xff] }
 0x226   : > { %1383 = vrot.lane.b32.xlu2 %v1377_v26, %s2398_s24  ;;  %1363 = vrot.lane.b32.xlu1 %v1377_v26, %s2399_s25 }
 0x227   : > { %1387 = vrot.lane.b32.xlu0 %v1379_v27, %s2398_s24 }
 0x22e   : > { %1343 = vrot.lane.b32.xlu1 %v1377_v26, %s2400_s26  ;;  %1365 = vrot.lane.b32.xlu2 %v1207_v25, %s2399_s25 }
 0x22f   : > { %1367 = vrot.lane.b32.xlu0 %v1379_v27, %s2399_s25 }
 0x236   : > { %1323 = vrot.lane.b32.xlu1 %v1377_v26, %s2401_s27  ;;  %1345 = vrot.lane.b32.xlu2 %v1207_v25, %s2400_s26 }
 0x237   : > { %1347 = vrot.lane.b32.xlu0 %v1379_v27, %s2400_s26 }
 0x23e   : > { %1303 = vrot.lane.b32.xlu1 %v1377_v26, %s2394_s20  ;;  %1325 = vrot.lane.b32.xlu2 %v1207_v25, %s2401_s27 }
 0x23f   : > { %1327 = vrot.lane.b32.xlu0 %v1379_v27, %s2401_s27 }
 0x246   : > { %1283 = vrot.lane.b32.xlu1 %v1377_v26, %s2404_s17  ;;  %1305 = vrot.lane.b32.xlu2 %v1207_v25, %s2394_s20 }
 0x247   : > { %1307 = vrot.lane.b32.xlu0 %v1379_v27, %s2394_s20 }
 0x24e   : > { %1263 = vrot.lane.b32.xlu1 %v1377_v26, %s2406_s15  ;;  %1285 = vrot.lane.b32.xlu2 %v1207_v25, %s2404_s17 }
 0x24f   : > { %1287 = vrot.lane.b32.xlu0 %v1379_v27, %s2404_s17 }
 0x256   : > { %1243 = vrot.lane.b32.xlu1 %v1377_v26, %s2407_s22  ;;  %1265 = vrot.lane.b32.xlu2 %v1207_v25, %s2406_s15 }
 0x257   : > { %1267 = vrot.lane.b32.xlu0 %v1379_v27, %s2406_s15 }
 0x25e   : > { %1223 = vrot.lane.b32.xlu1 %v1377_v26, %s2408_s19  ;;  %1245 = vrot.lane.b32.xlu2 %v1207_v25, %s2407_s22 }
 0x25f   : > { %1247 = vrot.lane.b32.xlu0 %v1379_v27, %s2407_s22 }
 0x266   : > { %1227 = vrot.lane.b32.xlu1 %v1379_v27, %s2408_s19  ;;  %1225 = vrot.lane.b32.xlu2 %v1207_v25, %s2408_s19 }
 0x26e   : > { %1428 = vperm.xlu2 %2383, %v1425_v6  }
 0x280   : > { %v1384_v28 = vpop.permute.xlu2 %1383 }
 0x288   : > { %v1366_v29 = vpop.permute.xlu2 %1365 }
 0x290   : > { %v1346_v32 = vpop.permute.xlu2 %1345 }
 0x291   : > { %v1386_v30 = vpop.permute.xlu0 %1385 }
 0x292   : > { %v1389_v31 = vsel %vm803_vm6, %v1384_v28, %v1386_v30 }
 0x293   : > { %1442 = vmatpush.msra.mxu3 %v1389_v31 }
 0x298   : > { %v1364_v33 = vpop.permute.xlu1 %1363  ;;  %v1326_v37 = vpop.permute.xlu2 %1325 }
 0x299   : > { %v1369_v34 = vsel %vm782_vm8, %v1364_v33, %v1366_v29  ;;  %v1388_v35 = vpop.permute.xlu0 %1387 }
 0x29a   : > { %v1390_v36 = vsel %vm803_vm6, %v1386_v30, %v1388_v35  ;;  %1396 = vst.msk [vmem:[#allocation4 + $0xd0] sm:$0xff] %vm622_vm0, %v1388_v35  ;;  %1443 = vmatpush.msra.mxu3 %v1369_v34 }
 0x29b   : > { %1462 = vmatpush.msrb.mxu0 %v1390_v36 }
 0x2a0   : > { %v1344_v38 = vpop.permute.xlu1 %1343  ;;  %v1306_v44 = vpop.permute.xlu2 %1305 }
 0x2a1   : > { %v1349_v40 = vsel %vm761_vm11, %v1344_v38, %v1346_v32  ;;  %v1368_v41 = vpop.permute.xlu0 %1367  ;;  %v1424_v42 = vld [vmem:[#allocation4 + $0xd0] sm:$0xff] }
 0x2a2   : > { %v1370_v43 = vsel %vm782_vm8, %v1366_v29, %v1368_v41  ;;  %1376 = vst.msk [vmem:[#allocation4 + $0xb8] sm:$0xff] %vm622_vm0, %v1368_v41  ;;  %1444 = vmatpush.msra.mxu3 %v1349_v40  ;;  %1482 = vmatpush.msra.mxu2 %v1424_v42 }
 0x2a3   : > { %1463 = vmatpush.msrb.mxu0 %v1370_v43 }
 0x2a8   : > { %v1324_v45 = vpop.permute.xlu1 %1323  ;;  %v1286_v54 = vpop.permute.xlu2 %1285 }
 0x2a9   : > { %v1329_v46 = vsel %vm740_vm12, %v1324_v45, %v1326_v37  ;;  %v1348_v47 = vpop.permute.xlu0 %1347  ;;  %v1421_v48 = vld [vmem:[#allocation4 + $0xb8] sm:$0xff] }
 0x2aa   : > { %v1350_v49 = vsel %vm761_vm11, %v1346_v32, %v1348_v47  ;;  %1356 = vst.msk [vmem:[#allocation4 + $0xa0] sm:$0xff] %vm622_vm0, %v1348_v47  ;;  %1445 = vmatpush.msra.mxu3 %v1329_v46  ;;  %1483 = vmatpush.msra.mxu2 %v1421_v48 }
 0x2ab   : > { %1464 = vmatpush.msrb.mxu0 %v1350_v49 }
 0x2b0   : > { %v1304_v50 = vpop.permute.xlu1 %1303  ;;  %v1266_v63 = vpop.permute.xlu2 %1265 }
 0x2b1   : > { %v1309_v51 = vsel %vm614_vm3, %v1304_v50, %v1306_v44  ;;  %v1328_v52 = vpop.permute.xlu0 %1327  ;;  %v1418_v53 = vld [vmem:[#allocation4 + $0xa0] sm:$0xff] }
 0x2b2   : > { %v1330_v55 = vsel %vm740_vm12, %v1326_v37, %v1328_v52  ;;  %1336 = vst.msk [vmem:[#allocation4 + $0x88] sm:$0xff] %vm622_vm0, %v1328_v52  ;;  %1446 = vmatpush.msra.mxu3 %v1309_v51  ;;  %1484 = vmatpush.msra.mxu2 %v1418_v53 }
 0x2b3   : > { %1465 = vmatpush.msrb.mxu0 %v1330_v55 }
 0x2b8   : > { %v1284_v56 = vpop.permute.xlu1 %1283  ;;  %v1246_v7 = vpop.permute.xlu2 %1245 }
 0x2b9   : > { %v1289_v57 = vsel %vm3288_vm14, %v1284_v56, %v1286_v54  ;;  %v1308_v59 = vpop.permute.xlu0 %1307  ;;  %v1415_v61 = vld [vmem:[#allocation4 + $0x88] sm:$0xff] }
 0x2ba   : > { %v1310_v62 = vsel %vm614_vm3, %v1306_v44, %v1308_v59  ;;  %1316 = vst.msk [vmem:[#allocation4 + $0x70] sm:$0xff] %vm622_vm0, %v1308_v59  ;;  %1447 = vmatpush.msra.mxu3 %v1289_v57  ;;  %1485 = vmatpush.msra.mxu2 %v1415_v61  ;;  %v1736_v44 = vld [vmem:[%s3277_s9] sm:$0xff] }
 0x2bb   : > { %1466 = vmatpush.msrb.mxu0 %v1310_v62 }
 0x2c0   : > { %v1264_v1 = vpop.permute.xlu1 %1263  ;;  %v1226_v16 = vpop.permute.xlu2 %1225 }
 0x2c1   : > { %v1269_v39 = vsel %vm3289_vm15, %v1264_v1, %v1266_v63  ;;  %v1288_v2 = vpop.permute.xlu0 %1287  ;;  %v1412_v3 = vld [vmem:[#allocation4 + $0x70] sm:$0xff] }
 0x2c2   : > { %v1290_v4 = vsel %vm3288_vm14, %v1286_v54, %v1288_v2  ;;  %1296 = vst.msk [vmem:[#allocation4 + $0x58] sm:$0xff] %vm622_vm0, %v1288_v2  ;;  %1448 = vmatpush.msra.mxu3 %v1269_v39  ;;  %1486 = vmatpush.msra.mxu2 %v1412_v3  ;;  %vm3297_vm14 = vcmask 875520  }
 0x2c3   : > { %1467 = vmatpush.msrb.mxu0 %v1290_v4 }
 0x2c8   : > { %v1244_v8 = vpop.permute.xlu1 %1243  ;;  %v1429_v23 = vpop.permute.xlu2 %1428 }
 0x2c9   : > { %v1249_v9 = vsel %vm3296_vm5, %v1244_v8, %v1246_v7  ;;  %v1268_v11 = vpop.permute.xlu0 %1267  ;;  %v1409_v12 = vld [vmem:[#allocation4 + $0x58] sm:$0xff] }
 0x2ca   : > { %v1270_v13 = vsel %vm3289_vm15, %v1266_v63, %v1268_v11  ;;  %1276 = vst.msk [vmem:[#allocation4 + $0x40] sm:$0xff] %vm622_vm0, %v1268_v11  ;;  %1449 = vmatpush.msra.mxu3 %v1249_v9  ;;  %1487 = vmatpush.msra.mxu2 %v1409_v12  ;;  %vm3298_vm15 = vmmov %vm3297_vm14 }
 0x2cb   : > { %1468 = vmatpush.msrb.mxu0 %v1270_v13 }
 0x2d0   : > { %v1224_v10 = vpop.permute.xlu1 %1223 }
 0x2d1   : > { %v1229_v14 = vsel %vm3297_vm14, %v1224_v10, %v1226_v16  ;;  %v1248_v15 = vpop.permute.xlu0 %1247  ;;  %v1406_v60 = vld [vmem:[#allocation4 + $0x40] sm:$0xff] }
 0x2d2   : > { %v1250_v18 = vsel %vm3296_vm5, %v1246_v7, %v1248_v15  ;;  %1256 = vst.msk [vmem:[#allocation4 + $0x28] sm:$0xff] %vm622_vm0, %v1248_v15  ;;  %1450 = vmatpush.msra.mxu3 %v1229_v14  ;;  %1488 = vmatpush.msra.mxu2 %v1406_v60 }
 0x2d3   : > { %2324 = vmatmul.msk.f32.vlgmr.msra.gmra.mxu3 %vm1431_vm7, %v1397_v5  ;;  %1469 = vmatpush.msrb.mxu0 %v1250_v18 }
 0x2d8   : > { %v1228_v20 = vpop.permute.xlu1 %1227 }
 0x2d9   : > { %v1230_v0 = vsel %vm3298_vm15, %v1226_v16, %v1228_v20  ;;  %1236 = vst.msk [vmem:[#allocation4 + $0x10] sm:$0xff] %vm622_vm0, %v1228_v20  ;;  %v1403_v21 = vld [vmem:[#allocation4 + $0x28] sm:$0xff] }
 0x2da   : > { %1489 = vmatpush.msra.mxu2 %v1403_v21  ;;  %1470 = vmatpush.msrb.mxu0 %v1230_v0 }
 0x2db   : > { %2325 = vmatmul.msk.f32.vlgmr.msrb.gmra.mxu0 %vm1431_vm7, %v1397_v5 }
 0x2e0   : > { %v1400_v22 = vld [vmem:[#allocation4 + $0x10] sm:$0xff] }
 0x2e1   : > { %1490 = vmatpush.msra.mxu2 %v1400_v22 }
 0x2e2   : > { %2326 = vmatmul.msk.f32.vlgmr.msra.gmra.mxu2 %vm1431_vm7, %v1397_v5 }
 0x356   : > { %v1452_v24 = vpop.f32.mrf.mxu3 }
 0x357   : > { %v1453_v25 = vadd.f32 %v1452_v24, %v1429_v23 }
 0x358   : > { %v1472_v26 = vpop.f32.mrf.mxu0 }
 0x359   : > { %v1473_v27 = vadd.f32 %v1472_v26, %v1429_v23  ;;  %vm1495_vm14 = vcmp.ge.f32.partialorder %v1453_v25, 0.0  ;;  %v1498_v28 = vmul.f32 0.1, %v1453_v25 }
 0x35b   : > { %v1499_v29 = vmul.f32 0.1, %v1473_v27  ;;  %v1501_v30 = vsel %vm1495_vm14, %v1453_v25, %v1498_v28  ;;  %vm1496_vm15 = vcmp.ge.f32.partialorder %v1473_v27, 0.0  ;;  %v1708_v28 = vld [vmem:[%s3271_s3] sm:$0xff]  ;;  %vm1824_vm14 = vcmask 392448  }
 0x35c   : > { %v1508_v31 = vsel %vm2823_vm10, %v1501_v30, 0.0  ;;  %vm1192_vm10 = vcmask 130048  }
 0x35d   : > { %1514 = vrot.lane.b32.xlu0 %v1508_v31, %s2410_s16  ;;  %v1502_v32 = vsel %vm1496_vm15, %v1473_v27, %v1499_v29  ;;  %vm1829_vm15 = vcmask 523648  }
 0x35e   : > { %v1509_v33 = vsel %vm2807_vm9, %v1502_v32, 0.0 }
 0x35f   : > { %1516 = vrot.lane.b32.xlu1 %v1509_v33, %s2410_s16 }
 0x365   : > { %v1492_v34 = vpop.f32.mrf.mxu2 }
 0x366   : > { %v1493_v35 = vadd.f32 %v1492_v34, %v1429_v23 }
 0x368   : > { %v1500_v36 = vmul.f32 0.1, %v1493_v35  ;;  %vm1497_vm5 = vcmp.ge.f32.partialorder %v1493_v35, 0.0 }
 0x36a   : > { %v1503_v37 = vsel %vm1497_vm5, %v1493_v35, %v1500_v36  ;;  %vm1834_vm5 = vcmask 654848  }
 0x36b   : > { %v1510_v38 = vsel %vm2816_vm2, %v1503_v37, 0.0  ;;  %vm3305_vm2 = vcmask 875520  }
 0x36c   : > { %1518 = vrot.lane.b32.xlu2 %v1510_v38, %s2410_s16  ;;  %vm3306_vm9 = vmmov %vm3305_vm2  ;;  %s2339_s16 = sshll.u32 %s3311_s30, 4 }
 0x3c6   : > { %v1519_v40 = vpop.permute.xlu2 %1518 }
 0x3cf   : > { %v1515_v19 = vpop.permute.xlu0 %1514 }
 0x3d0   : > { %1525 = vst.msk [vmem:[#allocation3] sm:$0xff] %vm1212_vm1, %v1515_v19 }
 0x3d1   : > { %v1517_v41 = vpop.permute.xlu1 %1516 }
 0x3d2   : > { %v1520_v58 = vsel %vm1206_vm13, %v1515_v19, %v1517_v41  ;;  %v1521_v42 = vsel %vm1206_vm13, %v1517_v41, %v1519_v40 }
 0x3d3   : > { %1696 = vrot.lane.b32.xlu1 %v1520_v58, %s2398_s24  ;;  %1527 = vst.msk [vmem:[#allocation3 + $0x10] sm:$0xff] %vm1215_vm4, %v1521_v42 }
 0x3d7   : > { %v1688_v43 = vld [vmem:[#allocation3] sm:$0xff] }
 0x3d8   : > { %1694 = vrot.lane.b32.xlu0 %v1688_v43, %s2398_s24 }
 0x3da   : > { %v1690_v17 = vld [vmem:[#allocation3 + $0x10] sm:$0xff] }
 0x3db   : > { %1676 = vrot.lane.b32.xlu1 %v1520_v58, %s2399_s25  ;;  %1698 = vrot.lane.b32.xlu2 %v1690_v17, %s2398_s24  ;;  %s3307_s24 = smov 84  }
 0x3e0   : > { %1674 = vrot.lane.b32.xlu0 %v1688_v43, %s2399_s25 }
 0x3e3   : > { %1656 = vrot.lane.b32.xlu1 %v1520_v58, %s2400_s26  ;;  %1678 = vrot.lane.b32.xlu2 %v1690_v17, %s2399_s25  ;;  %s2413_s25 = smov 72  }
 0x3e8   : > { %1654 = vrot.lane.b32.xlu0 %v1688_v43, %s2400_s26 }
 0x3eb   : > { %1636 = vrot.lane.b32.xlu1 %v1520_v58, %s2401_s27  ;;  %1658 = vrot.lane.b32.xlu2 %v1690_v17, %s2400_s26  ;;  %s2414_s26 = smov 76  }
 0x3f0   : > { %1634 = vrot.lane.b32.xlu0 %v1688_v43, %s2401_s27 }
 0x3f3   : > { %1616 = vrot.lane.b32.xlu1 %v1520_v58, %s2394_s20  ;;  %1638 = vrot.lane.b32.xlu2 %v1690_v17, %s2401_s27  ;;  %s2415_s27 = smov 92  }
 0x3f8   : > { %1614 = vrot.lane.b32.xlu0 %v1688_v43, %s2394_s20 }
 0x3fb   : > { %1596 = vrot.lane.b32.xlu1 %v1520_v58, %s2404_s17  ;;  %1618 = vrot.lane.b32.xlu2 %v1690_v17, %s2394_s20  ;;  %s2980_s20 = scalar_lea.vmem %s3280_s12, %s2339_s16 }
 0x400   : > { %1594 = vrot.lane.b32.xlu0 %v1688_v43, %s2404_s17 }
 0x403   : > { %1576 = vrot.lane.b32.xlu1 %v1520_v58, %s2406_s15  ;;  %1598 = vrot.lane.b32.xlu2 %v1690_v17, %s2404_s17  ;;  %s2416_s17 = smov 96  }
 0x408   : > { %1574 = vrot.lane.b32.xlu0 %v1688_v43, %s2406_s15 }
 0x40b   : > { %1556 = vrot.lane.b32.xlu1 %v1520_v58, %s2407_s22  ;;  %1578 = vrot.lane.b32.xlu2 %v1690_v17, %s2406_s15  ;;  %s2418_s15 = smov 120  }
 0x410   : > { %1554 = vrot.lane.b32.xlu0 %v1688_v43, %s2407_s22 }
 0x413   : > { %1536 = vrot.lane.b32.xlu1 %v1520_v58, %s2408_s19  ;;  %1558 = vrot.lane.b32.xlu2 %v1690_v17, %s2407_s22  ;;  %s2412_s22 = smov 68  }
 0x418   : > { %1534 = vrot.lane.b32.xlu0 %v1688_v43, %s2408_s19 }
 0x41b   : > { %1538 = vrot.lane.b32.xlu2 %v1690_v17, %s2408_s19  ;;  %s2419_s19 = smov 116  }
 0x420   : > { %1739 = vperm.xlu0 %2382, %v1736_v44  }
 0x435   : > { %v1699_v45 = vpop.permute.xlu2 %1698 }
 0x436   : > { %1707 = vst.msk [vmem:[#allocation4 + $0xd0] sm:$0xff] %vm622_vm0, %v1699_v45 }
 0x43d   : > { %v1679_v46 = vpop.permute.xlu2 %1678  ;;  %v1735_v47 = vld [vmem:[#allocation4 + $0xd0] sm:$0xff] }
 0x43e   : > { %1687 = vst.msk [vmem:[#allocation4 + $0xb8] sm:$0xff] %vm622_vm0, %v1679_v46  ;;  %1792 = vmatpush.msra.mxu0 %v1735_v47 }
 0x445   : > { %v1697_v48 = vpop.permute.xlu1 %1696  ;;  %v1659_v49 = vpop.permute.xlu2 %1658  ;;  %v1732_v50 = vld [vmem:[#allocation4 + $0xb8] sm:$0xff] }
 0x446   : > { %v1701_v51 = vsel %vm803_vm6, %v1697_v48, %v1699_v45  ;;  %1667 = vst.msk [vmem:[#allocation4 + $0xa0] sm:$0xff] %vm622_vm0, %v1659_v49  ;;  %1793 = vmatpush.msra.mxu0 %v1732_v50  ;;  %v2035_v50 = vld [vmem:[%s3274_s6 + $0x1e8] sm:$0xff] }
 0x447   : > { %1772 = vmatpush.msrb.mxu1 %v1701_v51  ;;  %v2033_v51 = vld [vmem:[%s3274_s6 + $0x1d8] sm:$0xff] }
 0x44a   : > { %v1695_v52 = vpop.permute.xlu0 %1694 }
 0x44b   : > { %v1700_v53 = vsel %vm803_vm6, %v1695_v52, %v1697_v48  ;;  %vm3299_vm6 = vcmask 711680   ;;  %v2031_v52 = vld [vmem:[%s3274_s6 + $0x1c8] sm:$0xff] }
 0x44c   : > { %1752 = vmatpush.msrb.mxu3 %v1700_v53  ;;  %v2029_v53 = vld [vmem:[%s3274_s6 + $0x1b8] sm:$0xff] }
 0x44d   : > { %v1677_v54 = vpop.permute.xlu1 %1676  ;;  %v1639_v55 = vpop.permute.xlu2 %1638  ;;  %v1729_v56 = vld [vmem:[#allocation4 + $0xa0] sm:$0xff] }
 0x44e   : > { %v1681_v57 = vsel %vm782_vm8, %v1677_v54, %v1679_v46  ;;  %1647 = vst.msk [vmem:[#allocation4 + $0x88] sm:$0xff] %vm622_vm0, %v1639_v55  ;;  %1794 = vmatpush.msra.mxu0 %v1729_v56  ;;  %v2023_v56 = vld [vmem:[%s3274_s6 + $0x188] sm:$0xff] }
 0x44f   : > { %1773 = vmatpush.msrb.mxu1 %v1681_v57  ;;  %v2021_v57 = vld [vmem:[%s3274_s6 + $0x178] sm:$0xff] }
 0x452   : > { %v1675_v59 = vpop.permute.xlu0 %1674 }
 0x453   : > { %v1680_v61 = vsel %vm782_vm8, %v1675_v59, %v1677_v54  ;;  %vm3300_vm8 = vmmov %vm3299_vm6  ;;  %v2027_v54 = vld [vmem:[%s3274_s6 + $0x1a8] sm:$0xff] }
 0x454   : > { %1753 = vmatpush.msrb.mxu3 %v1680_v61  ;;  %v2019_v59 = vld [vmem:[%s3274_s6 + $0x168] sm:$0xff]  ;;  %v2004_v61 = vld [vmem:[%s3274_s6 + $0xf0] sm:$0xff] }
 0x455   : > { %v1657_v62 = vpop.permute.xlu1 %1656  ;;  %v1619_v63 = vpop.permute.xlu2 %1618  ;;  %v1726_v1 = vld [vmem:[#allocation4 + $0x88] sm:$0xff] }
 0x456   : > { %v1661_v39 = vsel %vm761_vm11, %v1657_v62, %v1659_v49  ;;  %1627 = vst.msk [vmem:[#allocation4 + $0x70] sm:$0xff] %vm622_vm0, %v1619_v63  ;;  %1795 = vmatpush.msra.mxu0 %v1726_v1  ;;  %v2037_v49 = vld [vmem:[%s3274_s6 + $0x1f8] sm:$0xff]  ;;  %v2015_v1 = vld [vmem:[%s3274_s6 + $0x148] sm:$0xff] }
 0x457   : > { %1774 = vmatpush.msrb.mxu1 %v1661_v39  ;;  %v2000_v39 = vld [vmem:[%s3274_s6 + $0xd0] sm:$0xff] }
 0x45a   : > { %v1655_v2 = vpop.permute.xlu0 %1654 }
 0x45b   : > { %v1660_v3 = vsel %vm761_vm11, %v1655_v2, %v1657_v62  ;;  %vm3301_vm11 = vcmask 859136   ;;  %v2017_v62 = vld [vmem:[%s3274_s6 + $0x158] sm:$0xff] }
 0x45c   : > { %1754 = vmatpush.msrb.mxu3 %v1660_v3  ;;  %v2013_v2 = vld [vmem:[%s3274_s6 + $0x138] sm:$0xff]  ;;  %v1998_v3 = vld [vmem:[%s3274_s6 + $0xc0] sm:$0xff] }
 0x45d   : > { %v1637_v4 = vpop.permute.xlu1 %1636  ;;  %v1599_v6 = vpop.permute.xlu2 %1598  ;;  %v1723_v7 = vld [vmem:[#allocation4 + $0x70] sm:$0xff] }
 0x45e   : > { %v1641_v8 = vsel %vm740_vm12, %v1637_v4, %v1639_v55  ;;  %1607 = vst.msk [vmem:[#allocation4 + $0x58] sm:$0xff] %vm622_vm0, %v1599_v6  ;;  %1796 = vmatpush.msra.mxu0 %v1723_v7  ;;  %v2025_v55 = vld [vmem:[%s3274_s6 + $0x198] sm:$0xff]  ;;  %v1996_v7 = vld [vmem:[%s3274_s6 + $0xb0] sm:$0xff] }
 0x45f   : > { %1775 = vmatpush.msrb.mxu1 %v1641_v8  ;;  %v2009_v8 = vld [vmem:[%s3274_s6 + $0x118] sm:$0xff] }
 0x462   : > { %v1635_v9 = vpop.permute.xlu0 %1634 }
 0x463   : > { %v1640_v11 = vsel %vm740_vm12, %v1635_v9, %v1637_v4  ;;  %vm3303_vm12 = vcmask 867328   ;;  %v1994_v9 = vld [vmem:[%s3274_s6 + $0xa0] sm:$0xff] }
 0x464   : > { %1755 = vmatpush.msrb.mxu3 %v1640_v11  ;;  %v2007_v11 = vld [vmem:[%s3274_s6 + $0x108] sm:$0xff] }
 0x465   : > { %v1617_v12 = vpop.permute.xlu1 %1616  ;;  %v1579_v13 = vpop.permute.xlu2 %1578  ;;  %v1720_v16 = vld [vmem:[#allocation4 + $0x58] sm:$0xff] }
 0x466   : > { %v1621_v10 = vsel %vm614_vm3, %v1617_v12, %v1619_v63  ;;  %1587 = vst.msk [vmem:[#allocation4 + $0x40] sm:$0xff] %vm622_vm0, %v1579_v13  ;;  %1797 = vmatpush.msra.mxu0 %v1720_v16  ;;  %v2002_v63 = vld [vmem:[%s3274_s6 + $0xe0] sm:$0xff] }
 0x467   : > { %1776 = vmatpush.msrb.mxu1 %v1621_v10 }
 0x46a   : > { %v1615_v5 = vpop.permute.xlu0 %1614 }
 0x46b   : > { %v1620_v14 = vsel %vm614_vm3, %v1615_v5, %v1617_v12  ;;  %vm3302_vm3 = vmmov %vm3301_vm11  ;;  %v1992_v12 = vld [vmem:[%s3274_s6 + $0x90] sm:$0xff] }
 0x46c   : > { %1756 = vmatpush.msrb.mxu3 %v1620_v14  ;;  %v1988_v14 = vld [vmem:[%s3274_s6 + $0x70] sm:$0xff] }
 0x46d   : > { %v1597_v15 = vpop.permute.xlu1 %1596  ;;  %v1559_v60 = vpop.permute.xlu2 %1558  ;;  %v1717_v18 = vld [vmem:[#allocation4 + $0x40] sm:$0xff] }
 0x46e   : > { %v1601_v20 = vsel %vm3299_vm6, %v1597_v15, %v1599_v6  ;;  %1567 = vst.msk [vmem:[#allocation4 + $0x28] sm:$0xff] %vm622_vm0, %v1559_v60  ;;  %1798 = vmatpush.msra.mxu0 %v1717_v18  ;;  %v2011_v6 = vld [vmem:[%s3274_s6 + $0x128] sm:$0xff]  ;;  %v1982_v18 = vld [vmem:[%s3274_s6 + $0x40] sm:$0xff]  ;;  %vm1839_vm6 = vcmask 786048  }
 0x46f   : > { %1777 = vmatpush.msrb.mxu1 %v1601_v20 }
 0x472   : > { %v1595_v0 = vpop.permute.xlu0 %1594 }
 0x473   : > { %v1600_v21 = vsel %vm3300_vm8, %v1595_v0, %v1597_v15  ;;  %v1986_v15 = vld [vmem:[%s3274_s6 + $0x60] sm:$0xff]  ;;  %v1980_v0 = vld [vmem:[%s3274_s6 + $0x30] sm:$0xff]  ;;  %vm1849_vm8 = vcmask 917248  }
 0x474   : > { %1757 = vmatpush.msrb.mxu3 %v1600_v21 }
 0x475   : > { %v1577_v22 = vpop.permute.xlu1 %1576  ;;  %v1539_v23 = vpop.permute.xlu2 %1538  ;;  %v1714_v24 = vld [vmem:[#allocation4 + $0x28] sm:$0xff] }
 0x476   : > { %v1581_v25 = vsel %vm3301_vm11, %v1577_v22, %v1579_v13  ;;  %1547 = vst.msk [vmem:[#allocation4 + $0x10] sm:$0xff] %vm622_vm0, %v1539_v23  ;;  %1799 = vmatpush.msra.mxu0 %v1714_v24  ;;  %vm3304_vm0 = vmmov %vm3303_vm12  ;;  %v1990_v13 = vld [vmem:[%s3274_s6 + $0x80] sm:$0xff]  ;;  %v1976_v24 = vld [vmem:[%s3274_s6 + $0x10] sm:$0xff]  ;;  %vm1854_vm11 = vcmask 1048448  }
 0x477   : > { %1778 = vmatpush.msrb.mxu1 %v1581_v25  ;;  %v1974_v25 = vld [vmem:[%s3274_s6] sm:$0xff] }
 0x47a   : > { %v1575_v26 = vpop.permute.xlu0 %1574 }
 0x47b   : > { %v1580_v27 = vsel %vm3302_vm3, %v1575_v26, %v1577_v22  ;;  %v1978_v22 = vld [vmem:[%s3274_s6 + $0x20] sm:$0xff]  ;;  %vm1905_vm3 = vcmask 64512  }
 0x47c   : > { %1758 = vmatpush.msrb.mxu3 %v1580_v27 }
 0x47d   : > { %v1557_v29 = vpop.permute.xlu1 %1556  ;;  %v1711_v30 = vld [vmem:[#allocation4 + $0x10] sm:$0xff] }
 0x47e   : > { %v1561_v31 = vsel %vm3303_vm12, %v1557_v29, %v1559_v60  ;;  %1800 = vmatpush.msra.mxu0 %v1711_v30  ;;  %v1984_v60 = vld [vmem:[%s3274_s6 + $0x50] sm:$0xff]  ;;  %vm1846_vm12 = vcmask 850944  }
 0x47f   : > { %1779 = vmatpush.msrb.mxu1 %v1561_v31  ;;  %2329 = vmatmul.msk.f32.vlgmr.msra.gmra.mxu0 %vm1431_vm7, %v1708_v28  ;;  %v2005_v31 = vld [vmem:[%s3274_s6 + $0xf8] sm:$0xff] }
 0x480   : > { %2098 = vmatpush.msrb.mxu0 %v2037_v49 }
 0x482   : > { %v1555_v32 = vpop.permute.xlu0 %1554  ;;  %2099 = vmatpush.msrb.mxu0 %v2035_v50  ;;  %v1985_v50 = vld [vmem:[%s3274_s6 + $0x58] sm:$0xff] }
 0x483   : > { %v1560_v33 = vsel %vm3304_vm0, %v1555_v32, %v1557_v29 }
 0x484   : > { %1759 = vmatpush.msrb.mxu3 %v1560_v33  ;;  %2100 = vmatpush.msrb.mxu0 %v2033_v51  ;;  %v1891_v33 = vld [vmem:[%s3272_s4] sm:$0xff] }
 0x485   : > { %v1537_v34 = vpop.permute.xlu1 %1536  ;;  %v2034_v51 = vld [vmem:[%s3274_s6 + $0x1e0] sm:$0xff] }
 0x486   : > { %v1541_v35 = vsel %vm3305_vm2, %v1537_v34, %v1539_v23  ;;  %2101 = vmatpush.msrb.mxu0 %v2031_v52  ;;  %v1983_v52 = vld [vmem:[%s3274_s6 + $0x48] sm:$0xff] }
 0x487   : > { %1780 = vmatpush.msrb.mxu1 %v1541_v35 }
 0x488   : > { %2328 = vmatmul.msk.f32.vlgmr.msrb.gmra.mxu1 %vm1431_vm7, %v1708_v28  ;;  %2102 = vmatpush.msrb.mxu0 %v2029_v53  ;;  %v2032_v53 = vld [vmem:[%s3274_s6 + $0x1d0] sm:$0xff] }
 0x489   : > { %2038 = vmatpush.msra.mxu1 %v2004_v61  ;;  %v2026_v61 = vld [vmem:[%s3274_s6 + $0x1a0] sm:$0xff] }
 0x48a   : > { %v1535_v36 = vpop.permute.xlu0 %1534  ;;  %2103 = vmatpush.msrb.mxu0 %v2027_v54  ;;  %v1981_v54 = vld [vmem:[%s3274_s6 + $0x38] sm:$0xff] }
 0x48b   : > { %v1540_v37 = vsel %vm3306_vm9, %v1535_v36, %v1537_v34  ;;  %2039 = vmatpush.msra.mxu1 %v2002_v63  ;;  %v2003_v34 = vld [vmem:[%s3274_s6 + $0xe8] sm:$0xff]  ;;  %v2001_v36 = vld [vmem:[%s3274_s6 + $0xd8] sm:$0xff]  ;;  %v2024_v63 = vld [vmem:[%s3274_s6 + $0x190] sm:$0xff]  ;;  %vm2118_vm9 = vcmask 523264  }
 0x48c   : > { %1760 = vmatpush.msrb.mxu3 %v1540_v37  ;;  %2104 = vmatpush.msrb.mxu0 %v2025_v55  ;;  %v2030_v55 = vld [vmem:[%s3274_s6 + $0x1c0] sm:$0xff] }
 0x48d   : > { %2327 = vmatmul.msk.f32.vlgmr.msrb.gmra.mxu3 %vm1431_vm7, %v1708_v28  ;;  %2040 = vmatpush.msra.mxu1 %v2000_v39  ;;  %vm1819_vm7 = vcmask 261248   ;;  %v2020_v39 = vld [vmem:[%s3274_s6 + $0x170] sm:$0xff] }
 0x48e   : > { %2105 = vmatpush.msrb.mxu0 %v2023_v56  ;;  %v1979_v56 = vld [vmem:[%s3274_s6 + $0x28] sm:$0xff] }
 0x48f   : > { %2041 = vmatpush.msra.mxu1 %v1998_v3  ;;  %v2016_v3 = vld [vmem:[%s3274_s6 + $0x150] sm:$0xff] }
 0x490   : > { %2106 = vmatpush.msrb.mxu0 %v2021_v57  ;;  %v2028_v57 = vld [vmem:[%s3274_s6 + $0x1b0] sm:$0xff] }
 0x491   : > { %2042 = vmatpush.msra.mxu1 %v1996_v7  ;;  %v2010_v7 = vld [vmem:[%s3274_s6 + $0x120] sm:$0xff] }
 0x492   : > { %v1740_v38 = vpop.permute.xlu0 %1739  ;;  %2107 = vmatpush.msrb.mxu0 %v2019_v59  ;;  %v1977_v59 = vld [vmem:[%s3274_s6 + $0x18] sm:$0xff] }
 0x493   : > { %2043 = vmatpush.msra.mxu1 %v1994_v9  ;;  %v2006_v9 = vld [vmem:[%s3274_s6 + $0x100] sm:$0xff] }
 0x494   : > { %2108 = vmatpush.msrb.mxu0 %v2017_v62  ;;  %v1975_v62 = vld [vmem:[%s3274_s6 + $0x8] sm:$0xff] }
 0x495   : > { %2044 = vmatpush.msra.mxu1 %v1992_v12 }
 0x496   : > { %2109 = vmatpush.msrb.mxu0 %v2015_v1  ;;  %v2022_v1 = vld [vmem:[%s3274_s6 + $0x180] sm:$0xff] }
 0x497   : > { %2045 = vmatpush.msra.mxu1 %v1990_v13 }
 0x498   : > { %2110 = vmatpush.msrb.mxu0 %v2013_v2  ;;  %v2018_v2 = vld [vmem:[%s3274_s6 + $0x160] sm:$0xff] }
 0x499   : > { %2046 = vmatpush.msra.mxu1 %v1988_v14 }
 0x49a   : > { %2111 = vmatpush.msrb.mxu0 %v2011_v6  ;;  %v2012_v6 = vld [vmem:[%s3274_s6 + $0x130] sm:$0xff] }
 0x49b   : > { %2047 = vmatpush.msra.mxu1 %v1986_v15 }
 0x49c   : > { %2112 = vmatpush.msrb.mxu0 %v2009_v8  ;;  %v2008_v8 = vld [vmem:[%s3274_s6 + $0x110] sm:$0xff] }
 0x49d   : > { %2048 = vmatpush.msra.mxu1 %v1984_v60 }
 0x49e   : > { %2113 = vmatpush.msrb.mxu0 %v2007_v11 }
 0x49f   : > { %2049 = vmatpush.msra.mxu1 %v1982_v18 }
 0x4a1   : > { %2050 = vmatpush.msra.mxu1 %v1980_v0 }
 0x4a3   : > { %2051 = vmatpush.msra.mxu1 %v1978_v22  ;;  %v1894_v22 = vld [vmem:[%s3278_s10 + $0x8] sm:$0xff] }
 0x4a5   : > { %2052 = vmatpush.msra.mxu1 %v1976_v24 }
 0x4a7   : > { %2053 = vmatpush.msra.mxu1 %v1974_v25 }
 0x4fc   : > { %v1802_v19 = vpop.f32.mrf.mxu0 }
 0x4fd   : > { %v1803_v40 = vadd.f32 %v1802_v19, %v1740_v38  ;;  %v1999_v19 = vld [vmem:[%s3274_s6 + $0xc8] sm:$0xff] }
 0x4ff   : > { %v1810_v41 = vmul.f32 0.1, %v1803_v40  ;;  %vm1807_vm13 = vcmp.ge.f32.partialorder %v1803_v40, 0.0 }
 0x501   : > { %v1813_v58 = vsel %vm1807_vm13, %v1803_v40, %v1810_v41  ;;  %v1997_v41 = vld [vmem:[%s3274_s6 + $0xb8] sm:$0xff] }
 0x502   : > { %1885 = vrot.lane.b32.xlu2 %v1813_v58, %s2412_s22  ;;  %1881 = vrot.lane.b32.xlu0 %v1813_v58, %s2413_s25  ;;  %s2420_s22 = smov 112   ;;  %s2421_s25 = smov 104  }
 0x503   : > { %1877 = vrot.lane.b32.xlu1 %v1813_v58, %s2414_s26  ;;  %s2422_s26 = smov 108   ;;  %v1892_v58 = vld [vmem:[%s3272_s4 + $0x8] sm:$0xff] }
 0x505   : > { %v1782_v42 = vpop.f32.mrf.mxu1 }
 0x506   : > { %v1783_v43 = vadd.f32 %v1782_v42, %v1740_v38  ;;  %v1995_v42 = vld [vmem:[%s3274_s6 + $0xa8] sm:$0xff] }
 0x508   : > { %vm1806_vm4 = vcmp.ge.f32.partialorder %v1783_v43, 0.0  ;;  %v1809_v17 = vmul.f32 0.1, %v1783_v43 }
 0x50a   : > { %v1812_v44 = vsel %vm1806_vm4, %v1783_v43, %v1809_v17  ;;  %v1993_v17 = vld [vmem:[%s3274_s6 + $0x98] sm:$0xff]  ;;  %vm2149_vm4 = vcmask 261120  }
 0x50b   : > { %1864 = vrot.lane.b32.xlu0 %v1812_v44, %s2395_s21  ;;  %1860 = vrot.lane.b32.xlu2 %v1812_v44, %s2415_s27  ;;  %s3308_s21 = smov 124   ;;  %s2423_s27 = smov 100  }
 0x50c   : > { %1856 = vrot.lane.b32.xlu1 %v1812_v44, %s2416_s17 }
 0x510   : > { %v1762_v45 = vpop.f32.mrf.mxu3 }
 0x511   : > { %v1763_v46 = vadd.f32 %v1762_v45, %v1740_v38  ;;  %v1989_v45 = vld [vmem:[%s3274_s6 + $0x78] sm:$0xff] }
 0x513   : > { %vm1805_vm1 = vcmp.ge.f32.partialorder %v1763_v46, 0.0  ;;  %v1808_v47 = vmul.f32 0.1, %v1763_v46  ;;  %1872 = vrot.lane.b32.xlu2 %v1812_v44, %s2417_s18 }
 0x514   : > { %1868 = vrot.lane.b32.xlu1 %v1812_v44, %s3307_s24 }
 0x515   : > { %v1811_v48 = vsel %vm1805_vm1, %v1763_v46, %v1808_v47  ;;  %v1987_v46 = vld [vmem:[%s3274_s6 + $0x68] sm:$0xff]  ;;  %v1893_v47 = vld [vmem:[%s3278_s10] sm:$0xff] }
 0x516   : > { %1816 = vrot.lane.b32.xlu0 %v1811_v48, %s3308_s21  ;;  %1814 = vst.msk [vmem:[%s2980_s20] sm:$0xff] %vm1192_vm10, %v1811_v48 }
 0x51b   : > { %1821 = vrot.lane.b32.xlu2 %v1811_v48, %s2418_s15 }
 0x51c   : > { %1826 = vrot.lane.b32.xlu1 %v1811_v48, %s2419_s19 }
 0x51e   : > { %1831 = vrot.lane.b32.xlu0 %v1811_v48, %s2420_s22 }
 0x523   : > { %1842 = vrot.lane.b32.xlu2 %v1811_v48, %s2421_s25 }
 0x524   : > { %1836 = vrot.lane.b32.xlu1 %v1811_v48, %s2422_s26  ;;  %v2036_v48 = vld [vmem:[%s3274_s6 + $0x1f0] sm:$0xff] }
 0x526   : > { %1844 = vrot.lane.b32.xlu0 %v1812_v44, %s2421_s25 }
 0x52c   : > { %1851 = vrot.lane.b32.xlu1 %v1812_v44, %s2423_s27  ;;  %v1991_v44 = vld [vmem:[%s3274_s6 + $0x88] sm:$0xff]  ;;  %s3309_s27 = sshll.u32 %s3311_s30, 5 }
 0x52d   : > { %s3233_s28 = scalar_lea.vmem %s3281_s13, %s3309_s27 }
 0x534   : > { %1897 = vperm.xlu1 %2384, %v1893_v47  }
 0x55c   : > { %v1886_v4 = vpop.permute.xlu2 %1885 }
 0x565   : > { %v1861_v5 = vpop.permute.xlu2 %1860 }
 0x56d   : > { %v1873_v23 = vpop.permute.xlu2 %1872 }
 0x574   : > { %v1882_v16 = vpop.permute.xlu0 %1881 }
 0x575   : > { %v1878_v10 = vpop.permute.xlu1 %1877  ;;  %v1822_v28 = vpop.permute.xlu2 %1821 }
 0x57d   : > { %v1865_v21 = vpop.permute.xlu0 %1864  ;;  %v1843_v37 = vpop.permute.xlu2 %1842 }
 0x57e   : > { %v1857_v20 = vpop.permute.xlu1 %1856 }
 0x57f   : > { %1859 = vst.msk [vmem:[%s2980_s20 + $0x8] sm:$0xff] %vm1192_vm10, %v1857_v20 }
 0x580   : > { %1863 = vst.msk [vmem:[%s2980_s20 + $0x8] sm:$0xff] %vm1819_vm7, %v1861_v5 }
 0x581   : > { %1867 = vst.msk [vmem:[%s2980_s20 + $0x8] sm:$0xff] %vm1824_vm14, %v1865_v21 }
 0x586   : > { %v1869_v26 = vpop.permute.xlu1 %1868 }
 0x587   : > { %1871 = vst.msk [vmem:[%s2980_s20 + $0x8] sm:$0xff] %vm1829_vm15, %v1869_v26 }
 0x588   : > { %v1817_v27 = vpop.permute.xlu0 %1816  ;;  %1875 = vst.msk [vmem:[%s2980_s20 + $0x8] sm:$0xff] %vm1834_vm5, %v1873_v23 }
 0x589   : > { %1820 = vst.msk [vmem:[%s2980_s20] sm:$0xff] %vm1819_vm7, %v1817_v27  ;;  %v2137_v27 = vld [vmem:[%s3279_s11] sm:$0xff] }
 0x58a   : > { %1880 = vst.msk [vmem:[%s2980_s20 + $0x8] sm:$0xff] %vm1839_vm6, %v1878_v10 }
 0x58b   : > { %1884 = vst.msk [vmem:[%s2980_s20 + $0x8] sm:$0xff] %vm1849_vm8, %v1882_v16 }
 0x58c   : > { %1888 = vst.msk [vmem:[%s2980_s20 + $0x8] sm:$0xff] %vm1854_vm11, %v1886_v4  ;;  %v2014_v4 = vld [vmem:[%s3274_s6 + $0x140] sm:$0xff] }
 0x58d   : > { %1825 = vst.msk [vmem:[%s2980_s20] sm:$0xff] %vm1824_vm14, %v1822_v28 }
 0x58e   : > { %v1827_v29 = vpop.permute.xlu1 %1826 }
 0x58f   : > { %1830 = vst.msk [vmem:[%s2980_s20] sm:$0xff] %vm1829_vm15, %v1827_v29 }
 0x590   : > { %v1832_v30 = vpop.permute.xlu0 %1831 }
 0x591   : > { %1835 = vst.msk [vmem:[%s2980_s20] sm:$0xff] %vm1834_vm5, %v1832_v30 }
 0x593   : > { %v3110_v32 = vld [vmem:[%s2980_s20 + $0x8] sm:$0xff] }
 0x594   : > { %1950 = vmatpush.msra.mxu3 %v3110_v32  ;;  %2114 = vmatmul.f32.vlgmr.msrb.gmra.mxu0 %v3110_v32 }
 0x595   : > { %2332 = vmatmul.msk.f32.vlgmr.msra.gmra.mxu3 %vm1905_vm3, %v1891_v33 }
 0x596   : > { %2078 = vmatpush.msrb.mxu3 %v2005_v31  ;;  %v1837_v35 = vpop.permute.xlu1 %1836 }
 0x597   : > { %1840 = vst.msk [vmem:[%s2980_s20] sm:$0xff] %vm1839_vm6, %v1837_v35 }
 0x598   : > { %2079 = vmatpush.msrb.mxu3 %v2003_v34  ;;  %v1845_v38 = vpop.permute.xlu0 %1844 }
 0x599   : > { %v1847_v40 = vsel %vm1846_vm12, %v1843_v37, %v1845_v38  ;;  %v2138_v38 = vld [vmem:[%s3279_s11 + $0x8] sm:$0xff] }
 0x59a   : > { %2080 = vmatpush.msrb.mxu3 %v2001_v36  ;;  %1850 = vst.msk [vmem:[%s2980_s20] sm:$0xff] %vm1849_vm8, %v1847_v40  ;;  %2146 = vperm.xlu1 %2384, %v2138_v38  }
 0x59c   : > { %2081 = vmatpush.msrb.mxu3 %v1999_v19 }
 0x59d   : > { %2333 = vmatmul.msk.f32.gmra.mxu3 %vm1905_vm3, %v1892_v58 }
 0x59e   : > { %2082 = vmatpush.msrb.mxu3 %v1997_v41  ;;  %v1852_v43 = vpop.permute.xlu1 %1851  ;;  %v2131_v41 = vld [vmem:[%s3273_s5] sm:$0xff] }
 0x59f   : > { %1855 = vst.msk [vmem:[%s2980_s20] sm:$0xff] %vm1854_vm11, %v1852_v43 }
 0x5a0   : > { %2083 = vmatpush.msrb.mxu3 %v1995_v42  ;;  %v2132_v42 = vld [vmem:[%s3273_s5 + $0x8] sm:$0xff] }
 0x5a2   : > { %2084 = vmatpush.msrb.mxu3 %v1993_v17 }
 0x5a4   : > { %2085 = vmatpush.msrb.mxu3 %v1991_v44 }
 0x5a6   : > { %2086 = vmatpush.msrb.mxu3 %v1989_v45  ;;  %v1889_v49 = vld [vmem:[%s2980_s20] sm:$0xff]  ;;  %v1898_v12 = vpop.permute.xlu1 %1897 }
 0x5a7   : > { %1927 = vmatpush.msrb.mxu2 %v1889_v49  ;;  %2054 = vmatmul.f32.vlgmr.msra.gmra.mxu1 %v1889_v49 }
 0x5a8   : > { %2087 = vmatpush.msrb.mxu3 %v1987_v46  ;;  %2330 = vmatmul.msk.f32.vlgmr.msrb.gmra.mxu2 %vm1905_vm3, %v1891_v33 }
 0x5a9   : > { %2058 = vmatpush.msra.mxu2 %v2036_v48 }
 0x5aa   : > { %2088 = vmatpush.msrb.mxu3 %v1985_v50 }
 0x5ab   : > { %2059 = vmatpush.msra.mxu2 %v2034_v51 }
 0x5ac   : > { %2089 = vmatpush.msrb.mxu3 %v1983_v52 }
 0x5ad   : > { %2060 = vmatpush.msra.mxu2 %v2032_v53 }
 0x5ae   : > { %2090 = vmatpush.msrb.mxu3 %v1981_v54 }
 0x5af   : > { %2061 = vmatpush.msra.mxu2 %v2030_v55 }
 0x5b0   : > { %2091 = vmatpush.msrb.mxu3 %v1979_v56  ;;  %2331 = vmatmul.msk.f32.gmra.mxu2 %vm1905_vm3, %v1892_v58 }
 0x5b1   : > { %2062 = vmatpush.msra.mxu2 %v2028_v57 }
 0x5b2   : > { %2092 = vmatpush.msrb.mxu3 %v1977_v59 }
 0x5b3   : > { %2063 = vmatpush.msra.mxu2 %v2026_v61 }
 0x5b4   : > { %2093 = vmatpush.msrb.mxu3 %v1975_v62 }
 0x5b5   : > { %2094 = vmatmul.f32.vlgmr.msrb.gmra.mxu3 %v1889_v49  ;;  %2064 = vmatpush.msra.mxu2 %v2024_v63 }
 0x5b7   : > { %2065 = vmatpush.msra.mxu2 %v2022_v1 }
 0x5b9   : > { %2066 = vmatpush.msra.mxu2 %v2020_v39 }
 0x5bb   : > { %2067 = vmatpush.msra.mxu2 %v2018_v2 }
 0x5bd   : > { %2068 = vmatpush.msra.mxu2 %v2016_v3 }
 0x5bf   : > { %2069 = vmatpush.msra.mxu2 %v2014_v4 }
 0x5c1   : > { %2070 = vmatpush.msra.mxu2 %v2012_v6 }
 0x5c3   : > { %2071 = vmatpush.msra.mxu2 %v2010_v7 }
 0x5c5   : > { %2072 = vmatpush.msra.mxu2 %v2008_v8 }
 0x5c7   : > { %2073 = vmatpush.msra.mxu2 %v2006_v9 }
 0x5c8   : > { %2074 = vmatmul.f32.vlgmr.msra.gmra.mxu2 %v3110_v32 }
 0x60c   : > { %v2147_v47 = vpop.permute.xlu1 %2146 }
 0x611   : > { %v2115_v20 = vpop.f32.mrf.mxu0 }
 0x618   : > { %v1952_v11 = vpop.f32.mrf.mxu3 }
 0x619   : > { %v1953_v13 = vadd.f32 %v1952_v11, %v1898_v12 }
 0x61b   : > { %vm1959_vm0 = vcmp.ge.f32.partialorder %v1953_v13, 0.0  ;;  %v1963_v16 = vmul.f32 0.1, %v1953_v13 }
 0x61d   : > { %v1967_v10 = vsel %vm1959_vm0, %v1953_v13, %v1963_v16 }
 0x61e   : > { %1971 = vst [vmem:[%s3233_s28 + $0x8] sm:$0xff] %v1967_v10 }
 0x620   : > { %v1955_v14 = vpop.f32.mrf.mxu3 }
 0x624   : > { %v2055_v24 = vpop.f32.mrf.mxu1 }
 0x62b   : > { %v1929_v5 = vpop.f32.mrf.mxu2 }
 0x62c   : > { %v1930_v15 = vadd.f32 %v1929_v5, %v1898_v12 }
 0x62e   : > { %vm1958_vm2 = vcmp.ge.f32.partialorder %v1930_v15, 0.0  ;;  %v1962_v60 = vmul.f32 0.1, %v1930_v15 }
 0x630   : > { %v1966_v18 = vsel %vm1958_vm2, %v1930_v15, %v1962_v60 }
 0x631   : > { %1970 = vst [vmem:[%s3233_s28] sm:$0xff] %v1966_v18 }
 0x633   : > { %v1932_v23 = vpop.f32.mrf.mxu2 }
 0x638   : > { %v2095_v0 = vpop.f32.mrf.mxu3 }
 0x639   : > { %v2116_v21 = vadd.f32 %v2115_v20, %v2095_v0 }
 0x63b   : > { %2125 = vst.msk [vmem:[#allocation5 + $0x10] sm:$0xff] %vm2118_vm9, %v2116_v21  ;;  %2127 = vrot.lane.b32.xlu2 %v2116_v21, %s2424_s23 }
 0x642   : > { %v2135_v33 = vld [vmem:[#allocation5 + $0x10] sm:$0xff] }
 0x643   : > { %1902 = vperm.xlu2 %2383, %v1894_v22  }
 0x64b   : > { %v2075_v25 = vpop.f32.mrf.mxu2 }
 0x64c   : > { %v2076_v26 = vadd.f32 %v2075_v25, %v2055_v24 }
 0x64e   : > { %2119 = vst.msk [vmem:[#allocation5] sm:$0xff] %vm2118_vm9, %v2076_v26  ;;  %2121 = vrot.lane.b32.xlu0 %v2076_v26, %s2424_s23  ;;  %s492_s23 = scalar_lea.vmem %s3282_s14, %s2339_s16 }
 0x655   : > { %v2133_v58 = vld [vmem:[#allocation5] sm:$0xff] }
 0x656   : > { %2141 = vperm.xlu0 %2382, %v2137_v27  }
 0x695   : > { %v2128_v28 = vpop.permute.xlu2 %2127 }
 0x696   : > { %2130 = vst.msk [vmem:[#allocation5 + $0x18] sm:$0xff] %vm2118_vm9, %v2128_v28 }
 0x69d   : > { %v1903_v29 = vpop.permute.xlu2 %1902  ;;  %v2136_v30 = vld [vmem:[#allocation5 + $0x18] sm:$0xff] }
 0x69e   : > { %v1933_v31 = vadd.f32 %v1932_v23, %v1903_v29  ;;  %v1956_v32 = vadd.f32 %v1955_v14, %v1903_v29  ;;  %2168 = vmatpush.msrb.mxu1 %v2136_v30 }
 0x6a0   : > { %vm1960_vm10 = vcmp.ge.f32.partialorder %v1933_v31, 0.0  ;;  %vm1961_vm13 = vcmp.ge.f32.partialorder %v1956_v32, 0.0  ;;  %v1964_v34 = vmul.f32 0.1, %v1933_v31  ;;  %v1965_v35 = vmul.f32 0.1, %v1956_v32  ;;  %2169 = vmatpush.msrb.mxu1 %v2135_v33 }
 0x6a2   : > { %v1968_v36 = vsel %vm1960_vm10, %v1933_v31, %v1964_v34  ;;  %v1969_v37 = vsel %vm1961_vm13, %v1956_v32, %v1965_v35 }
 0x6a3   : > { %1972 = vst [vmem:[%s3233_s28 + $0x10] sm:$0xff] %v1968_v36 }
 0x6a4   : > { %1973 = vst [vmem:[%s3233_s28 + $0x18] sm:$0xff] %v1969_v37 }
 0x6c0   : > { %v2122_v19 = vpop.permute.xlu0 %2121 }
 0x6c1   : > { %2124 = vst.msk [vmem:[#allocation5 + $0x8] sm:$0xff] %vm2118_vm9, %v2122_v19 }
 0x6c8   : > { %v2134_v40 = vld [vmem:[#allocation5 + $0x8] sm:$0xff]  ;;  %v2142_v43 = vpop.permute.xlu0 %2141 }
 0x6c9   : > { %2170 = vmatpush.msrb.mxu1 %v2134_v40 }
 0x6cb   : > { %2171 = vmatpush.msrb.mxu1 %v2133_v58 }
 0x6cc   : > { %2334 = vmatmul.msk.f32.vlgmr.msrb.gmra.mxu1 %vm2149_vm4, %v2131_v41 }
 0x6d4   : > { %2335 = vmatmul.msk.f32.gmra.mxu1 %vm2149_vm4, %v2132_v42 }
 0x749   : > { %v2173_v17 = vpop.f32.mrf.mxu1 }
 0x74a   : > { %v2174_v44 = vadd.f32 %v2173_v17, %v2142_v43 }
 0x74c   : > { %vm2179_vm1 = vcmp.ge.f32.partialorder %v2174_v44, 0.0  ;;  %v2181_v45 = vmul.f32 0.1, %v2174_v44 }
 0x74e   : > { %v2183_v46 = vsel %vm2179_vm1, %v2174_v44, %v2181_v45 }
 0x74f   : > { %2185 = vst.msk [vmem:[%s492_s23] sm:$0xff] %vm2118_vm9, %v2183_v46 }
 0x751   : > { %v2176_v48 = vpop.f32.mrf.mxu1 }
 0x752   : > { %v2177_v49 = vadd.f32 %v2176_v48, %v2147_v47 }
 0x754   : > { %vm2180_vm7 = vcmp.ge.f32.partialorder %v2177_v49, 0.0  ;;  %v2182_v50 = vmul.f32 0.1, %v2177_v49 }
 0x756   : > { %v2184_v51 = vsel %vm2180_vm7, %v2177_v49, %v2182_v50 }
 0x757   : > { %2186 = vst.msk [vmem:[%s492_s23 + $0x8] sm:$0xff] %vm2118_vm9, %v2184_v51 }
 0x758 PF: > { %s25_s29 = sadd.s32 1, %s2391_s29  }
 0x759   : > { %p22_p4 = scmp.ge.s32.totalorder %s25_s29, 4  }
 0x75b   :  { %24 = sbr.rel (!%p22_p4) target bundleno = 1 (0x1), region = 122 }

</bundles_post_ra>
